<compile_context>
chip_gen: v7x
topology: tpu7x:2x2x1
jax: 0.10.0
libtpu: 0.0.40
codegen_flags: <defaults>
</compile_context>

<pallas_src>
import functools

import jax
import jax.numpy as jnp
from jax.experimental import pallas as pl
from jax.experimental.pallas import tpu as pltpu


def _lstm_cell_from_gates(gates, c, H):
    # torch.nn.LSTM gate order: (i, f, g, o); gates: (B, 4H)
    i = jax.nn.sigmoid(gates[:, 0 * H:1 * H])
    f = jax.nn.sigmoid(gates[:, 1 * H:2 * H])
    g = jnp.tanh(gates[:, 2 * H:3 * H])
    o = jax.nn.sigmoid(gates[:, 3 * H:4 * H])
    c_new = f * c + i * g
    h_new = o * jnp.tanh(c_new)
    return h_new, c_new


def _decoder_kernel(H,
                    emb_ref, enc_ref, h0_ref, c0_ref,
                    w_lstm_ref, b_lstm_ref,
                    w_attn_cat_ref, w_ctx_out_ref, b_misc_ref,
                    out_ref, hn_ref, cn_ref, attnw_ref):
    x = emb_ref[...]                                  # (B, H)
    h_in = h0_ref[...]                                # (B, 4H) = [l0f | l0r | l1f | l1r]
    c_in = c0_ref[...]                                # (B, 4H)

    # ---- layer 0: both directions in ONE (B,4H)x(4H,8H) MXU pass -------------------
    # fused input = [x | h_l0f | h_l0r | x]; the trailing x multiplies zero weight rows.
    in0 = jnp.concatenate([x, h_in[:, 0:2 * H], x], axis=1)               # (B, 4H)
    g0 = (jnp.dot(in0, w_lstm_ref[0], preferred_element_type=jnp.float32)
          + b_lstm_ref[0:1, :])                                           # (B, 8H)
    h0f, c0f = _lstm_cell_from_gates(g0[:, 0:4 * H], c_in[:, 0 * H:1 * H], H)
    h0r, c0r = _lstm_cell_from_gates(g0[:, 4 * H:], c_in[:, 1 * H:2 * H], H)
    l0_out = jnp.concatenate([h0f, h0r], axis=1)                          # (B, 2H)

    # ---- layer 1 (inter-layer LSTM dropout: identity in eval mode) -----------------
    in1 = jnp.concatenate([l0_out, h_in[:, 2 * H:4 * H]], axis=1)         # (B, 4H)
    g1 = (jnp.dot(in1, w_lstm_ref[1], preferred_element_type=jnp.float32)
          + b_lstm_ref[1:2, :])                                           # (B, 8H)
    h1f, c1f = _lstm_cell_from_gates(g1[:, 0:4 * H], c_in[:, 2 * H:3 * H], H)
    h1r, c1r = _lstm_cell_from_gates(g1[:, 4 * H:], c_in[:, 3 * H:4 * H], H)
    rnn_out = jnp.concatenate([h1f, h1r], axis=1)                         # (B, 2H)

    # lane-dense state writeback: one unmasked (B, 4H) = (B, 128) store per tensor.
    hn_ref[...] = jnp.concatenate([l0_out, rnn_out], axis=1)
    cn_ref[...] = jnp.concatenate([c0f, c0r, c1f, c1r], axis=1)

    # ---- Luong 'general' attention over encoder outputs ----------------------------
    # score[b,l] = rnn_out[b] . (W enc[b,l] + b_attn) = (rnn_out W).enc[b,l] + rnn_out.b_attn
    enc = enc_ref[...]                                                    # (B, L, H)
    # one matmul produces both the attention query and the rnn half of the concat proj.
    fused = jnp.dot(rnn_out, w_attn_cat_ref[...],
                    preferred_element_type=jnp.float32)                   # (B, 2H)
    q = fused[:, 0:H]                                                     # (B, H)
    cat_from_rnn = fused[:, H:2 * H]                                      # (B, H)

    b_attn = b_misc_ref[:, 0:2 * H]                                       # (1, 2H)
    bias_term = jnp.sum(rnn_out * b_attn, axis=1, keepdims=True)          # (B, 1)
    # VPU multiply + reduce instead of degenerate batched matmuls.
    energies = jnp.sum(q[:, None, :] * enc, axis=-1) + bias_term          # (B, L)

    # softmax over encoder length (F.softmax default dim=1 for 2-D input)
    m = jnp.max(energies, axis=1, keepdims=True)
    p = jnp.exp(energies - m)
    attn_w = p * pl.reciprocal(jnp.sum(p, axis=1, keepdims=True), approx=False)
    attnw_ref[...] = attn_w                                               # (B, L)

    # context[b] = sum_l attn_w[b,l] * enc[b,l,:]  — VPU multiply + XLU reduce.
    context = jnp.sum(attn_w[:, :, None] * enc, axis=1)                   # (B, H)

    # ---- concat -> tanh -> output projection (concat split into two dots) ----------
    w_ctx = w_ctx_out_ref[:, 0:H]                                         # (H, H)
    w_out = w_ctx_out_ref[:, H:]                                          # (H, V)
    b_cat = b_misc_ref[:, 2 * H:3 * H]                                    # (1, H)
    b_out = b_misc_ref[:, 3 * H:]                                         # (1, V)
    concat_out = jnp.tanh(
        cat_from_rnn
        + jnp.dot(context, w_ctx, preferred_element_type=jnp.float32)
        + b_cat)                                                          # (B, H)
    out_ref[...] = (jnp.dot(concat_out, w_out, preferred_element_type=jnp.float32)
                    + b_out)                                              # (B, V)


def init_params(key, H, V):
    """Deterministic parameter init matching the module's shapes (unfused layout)."""
    scale = 1.0 / jnp.sqrt(jnp.float32(H))

    def uni(k, shape):
        return jax.random.uniform(k, shape, jnp.float32, -scale, scale)

    keys = iter(jax.random.split(key, 32))
    params = {
        'hidden_size': H,
        'output_size': V,
        'embedding': uni(next(keys), (V, H)),          # nn.Embedding(V, H)
        'lstm': [],
        # Attn 'general' projection, widened H -> 2H (see TODO at top of file)
        'w_attn': uni(next(keys), (2 * H, H)),
        'b_attn': uni(next(keys), (1, 2 * H)),
        # nn.Linear(3H, H), stored transposed
        'w_cat_t': uni(next(keys), (3 * H, H)),
        'b_cat': uni(next(keys), (1, H)),
        # nn.Linear(H, V), stored transposed
        'w_out_t': uni(next(keys), (H, V)),
        'b_out': uni(next(keys), (1, V)),
    }
    # 2 layers x 2 directions: [l0_fwd, l0_rev, l1_fwd, l1_rev]
    for layer in range(2):
        in_dim = H if layer == 0 else 2 * H
        for _direction in range(2):
            wih_t = uni(next(keys), (in_dim, 4 * H))   # transposed (4H, in_dim)
            whh_t = uni(next(keys), (H, 4 * H))        # transposed (4H, H)
            b_ih = uni(next(keys), (1, 4 * H))
            b_hh = uni(next(keys), (1, 4 * H))
            params['lstm'].append({'wih_t': wih_t, 'whh_t': whh_t, 'b': b_ih + b_hh})
    return params


def pack_params(params):
    """One-time host-side repack into the fused, DMA-friendly kernel layout."""
    H = params['hidden_size']
    V = params['output_size']
    cells = params['lstm']   # [l0_fwd, l0_rev, l1_fwd, l1_rev]

    def layer_block(cf, cr, in_dim):
        # rows: [0:in_dim]=x, [in_dim:in_dim+H]=h_fwd, [+H:+2H]=h_rev, rest zero-pad to 4H.
        top = jnp.concatenate([cf['wih_t'], cr['wih_t']], axis=1)                # (in_dim, 8H)
        mid = jnp.concatenate([cf['whh_t'], jnp.zeros_like(cf['whh_t'])], axis=1)  # (H, 8H)
        bot = jnp.concatenate([jnp.zeros_like(cr['whh_t']), cr['whh_t']], axis=1)  # (H, 8H)
        blk = jnp.concatenate([top, mid, bot], axis=0)
        pad = 4 * H - (in_dim + 2 * H)
        if pad:
            blk = jnp.concatenate([blk, jnp.zeros((pad, 8 * H), jnp.float32)], axis=0)
        return blk                                                               # (4H, 8H)

    w_lstm = jnp.stack([layer_block(cells[0], cells[1], H),
                        layer_block(cells[2], cells[3], 2 * H)], axis=0)         # (2, 4H, 8H)
    b_lstm = jnp.concatenate(
        [jnp.concatenate([cells[0]['b'], cells[1]['b']], axis=1),
         jnp.concatenate([cells[2]['b'], cells[3]['b']], axis=1)], axis=0)       # (2, 8H)

    w_attn_cat = jnp.concatenate([params['w_attn'],
                                  params['w_cat_t'][:2 * H, :]], axis=1)         # (2H, 2H)
    w_ctx_out = jnp.concatenate([params['w_cat_t'][2 * H:, :],
                                 params['w_out_t']], axis=1)                     # (H, H+V)
    b_misc = jnp.concatenate([params['b_attn'], params['b_cat'],
                              params['b_out']], axis=1)                          # (1, 3H+V)

    return {
        'hidden_size': H,
        'output_size': V,
        'embedding': params['embedding'],
        'w_lstm': w_lstm,
        'b_lstm': b_lstm,
        'w_attn_cat': w_attn_cat,
        'w_ctx_out': w_ctx_out,
        'b_misc': b_misc,
    }


def prepare_encoder_outputs(encoder_outputs):
    """Hoisted out of the per-step decode path: (L, B, H) -> (B, L, H) f32, once per sequence."""
    return jnp.transpose(encoder_outputs, (1, 0, 2)).astype(jnp.float32)


def luong_attn_decoder_forward(packed, input_seq, last_hidden, enc_blh):
    """input_seq: (B,) int32 token ids
       last_hidden: (h0, c0), each (n_layers*2, B, H)
       enc_blh: (B, L, H) f32 from prepare_encoder_outputs()
       returns (logits (B, V), (h_n, c_n), attn_weights (B, 1, L))"""
    h0, c0 = last_hidden
    B = input_seq.shape[0]
    L = enc_blh.shape[1]
    H = packed['hidden_size']
    V = packed['output_size']

    # glue: embedding gather (+ eval-mode dropout = identity); state packed lane-dense (B, 4H).
    embedded = jnp.take(packed['embedding'], input_seq, axis=0).astype(jnp.float32)   # (B, H)
    h0p = jnp.transpose(h0, (1, 0, 2)).reshape(B, 4 * H).astype(jnp.float32)
    c0p = jnp.transpose(c0, (1, 0, 2)).reshape(B, 4 * H).astype(jnp.float32)

    args = (embedded, enc_blh, h0p, c0p,
            packed['w_lstm'], packed['b_lstm'],
            packed['w_attn_cat'], packed['w_ctx_out'], packed['b_misc'])

    out_shapes = (
        jax.ShapeDtypeStruct((B, V), jnp.float32),        # logits
        jax.ShapeDtypeStruct((B, 4 * H), jnp.float32),    # h_n (packed, lane dense)
        jax.ShapeDtypeStruct((B, 4 * H), jnp.float32),    # c_n (packed, lane dense)
        jax.ShapeDtypeStruct((B, L), jnp.float32),        # attention weights
    )

    def vmem_spec():
        return pl.BlockSpec(memory_space=pltpu.MemorySpace.VMEM)

    fn = pl.pallas_call(
        functools.partial(_decoder_kernel, H),
        out_shape=out_shapes,
        in_specs=[vmem_spec() for _ in args],
        out_specs=tuple(vmem_spec() for _ in out_shapes),
    )
    logits, hn_p, cn_p, attn_w = fn(*args)

    # unpack to the PyTorch-compatible (n_layers*2, B, H) layout
    h_n = jnp.transpose(hn_p.reshape(B, 4, H), (1, 0, 2))
    c_n = jnp.transpose(cn_p.reshape(B, 4, H), (1, 0, 2))
    attn_weights = attn_w[:, None, :]   # (B, 1, L), matches .unsqueeze(1) in torch
    return logits, (h_n, c_n), attn_weights


if __name__ == "__main__":
    H, V, B, L = 32, 64, 4, 8
    n_layers = 2

    key = jax.random.PRNGKey(0)
    kp, k1, k2, k3, k4 = jax.random.split(key, 5)

    params = init_params(kp, H, V)
    packed = pack_params(params)                      # one-time host-side repack

    input_seq = jax.random.randint(k1, (B,), 0, V, dtype=jnp.int32)
    h0 = jax.random.normal(k2, (2 * n_layers, B, H), jnp.float32)
    c0 = jax.random.normal(k3, (2 * n_layers, B, H), jnp.float32)
    encoder_outputs = jax.random.normal(k4, (L, B, H), jnp.float32)
    enc_blh = prepare_encoder_outputs(encoder_outputs)   # once per sequence, not per step

    logits, (h_n, c_n), attn_w = luong_attn_decoder_forward(
        packed, input_seq, (h0, c0), enc_blh)
    jax.block_until_ready((logits, h_n, c_n, attn_w))

    assert logits.shape == (B, V)
    assert h_n.shape == (2 * n_layers, B, H) and c_n.shape == (2 * n_layers, B, H)
    assert attn_w.shape == (B, 1, L)
    # attention weights are a softmax -> rows sum to 1
    assert jnp.allclose(jnp.sum(attn_w, axis=-1), 1.0, atol=1e-5)
    print("KERNEL_OK")
</pallas_src>

<mosaic_0001>
module attributes {stable_mosaic.version = 11 : i64} {
  func.func @_decoder_kernel(%arg0: memref<4x32xf32, #tpu.memory_space<vmem>>, %arg1: memref<4x8x32xf32, #tpu.memory_space<vmem>>, %arg2: memref<4x128xf32, #tpu.memory_space<vmem>>, %arg3: memref<4x128xf32, #tpu.memory_space<vmem>>, %arg4: memref<2x128x256xf32, #tpu.memory_space<vmem>>, %arg5: memref<2x256xf32, #tpu.memory_space<vmem>>, %arg6: memref<64x64xf32, #tpu.memory_space<vmem>>, %arg7: memref<32x96xf32, #tpu.memory_space<vmem>>, %arg8: memref<1x160xf32, #tpu.memory_space<vmem>>, %arg9: memref<4x64xf32, #tpu.memory_space<vmem>>, %arg10: memref<4x128xf32, #tpu.memory_space<vmem>>, %arg11: memref<4x128xf32, #tpu.memory_space<vmem>>, %arg12: memref<4x8xf32, #tpu.memory_space<vmem>>) attributes {dimension_semantics = [], scalar_prefetch = 0 : i64, scratch_operands = 0 : i64, tpu.core_type = #tpu.core_type<tc>} {
    %c0 = arith.constant 0 : index
    %c0_0 = arith.constant 0 : index
    %0 = vector.load %arg0[%c0, %c0_0] : memref<4x32xf32, #tpu.memory_space<vmem>>, vector<4x32xf32>
    %c0_1 = arith.constant 0 : index
    %c0_2 = arith.constant 0 : index
    %1 = vector.load %arg2[%c0_1, %c0_2] : memref<4x128xf32, #tpu.memory_space<vmem>>, vector<4x128xf32>
    %c0_3 = arith.constant 0 : index
    %c0_4 = arith.constant 0 : index
    %2 = vector.load %arg3[%c0_3, %c0_4] : memref<4x128xf32, #tpu.memory_space<vmem>>, vector<4x128xf32>
    %3 = vector.extract_strided_slice %1 {offsets = [0, 0], sizes = [4, 64], strides = [1, 1]} : vector<4x128xf32> to vector<4x64xf32>
    %4 = tpu.concatenate %0, %3, %0 in 1 : vector<4x32xf32>, vector<4x64xf32>, vector<4x32xf32> -> vector<4x128xf32>
    %c0_5 = arith.constant 0 : index
    %c0_6 = arith.constant 0 : index
    %c0_7 = arith.constant 0 : index
    %5 = vector.load %arg4[%c0_5, %c0_6, %c0_7] : memref<2x128x256xf32, #tpu.memory_space<vmem>>, vector<1x128x256xf32>
    %6 = vector.shape_cast %5 : vector<1x128x256xf32> to vector<128x256xf32>
    %cst = arith.constant dense<0.000000e+00> : vector<4x256xf32>
    %7 = tpu.matmul %4, %6, %cst {dimension_numbers = #tpu.dot_dimension_numbers<[1], [0], [0], [1], [0, 0, 1, 1], [], []>} : vector<4x128xf32>, vector<128x256xf32>, vector<4x256xf32> -> vector<4x256xf32>
    %c0_8 = arith.constant 0 : index
    %c0_9 = arith.constant 0 : index
    %8 = vector.load %arg5[%c0_8, %c0_9] : memref<2x256xf32, #tpu.memory_space<vmem>>, vector<1x256xf32>
    %9 = vector.broadcast %8 : vector<1x256xf32> to vector<4x256xf32>
    %10 = arith.addf %7, %9 : vector<4x256xf32>
    %11 = vector.extract_strided_slice %10 {offsets = [0, 0], sizes = [4, 128], strides = [1, 1]} : vector<4x256xf32> to vector<4x128xf32>
    %12 = vector.extract_strided_slice %2 {offsets = [0, 0], sizes = [4, 32], strides = [1, 1]} : vector<4x128xf32> to vector<4x32xf32>
    %13 = vector.extract_strided_slice %11 {offsets = [0, 0], sizes = [4, 32], strides = [1, 1]} : vector<4x128xf32> to vector<4x32xf32>
    %14 = arith.negf %13 : vector<4x32xf32>
    %15 = math.exp %14 : vector<4x32xf32>
    %cst_10 = arith.constant 1.000000e+00 : f32
    %16 = vector.broadcast %cst_10 : f32 to vector<4x32xf32>
    %17 = arith.addf %16, %15 : vector<4x32xf32>
    %18 = arith.divf %16, %17 : vector<4x32xf32>
    %19 = vector.extract_strided_slice %11 {offsets = [0, 32], sizes = [4, 32], strides = [1, 1]} : vector<4x128xf32> to vector<4x32xf32>
    %20 = arith.negf %19 : vector<4x32xf32>
    %21 = math.exp %20 : vector<4x32xf32>
    %cst_11 = arith.constant 1.000000e+00 : f32
    %22 = vector.broadcast %cst_11 : f32 to vector<4x32xf32>
    %23 = arith.addf %22, %21 : vector<4x32xf32>
    %24 = arith.divf %22, %23 : vector<4x32xf32>
    %25 = vector.extract_strided_slice %11 {offsets = [0, 64], sizes = [4, 32], strides = [1, 1]} : vector<4x128xf32> to vector<4x32xf32>
    %26 = math.tanh %25 : vector<4x32xf32>
    %27 = vector.extract_strided_slice %11 {offsets = [0, 96], sizes = [4, 32], strides = [1, 1]} : vector<4x128xf32> to vector<4x32xf32>
    %28 = arith.negf %27 : vector<4x32xf32>
    %29 = math.exp %28 : vector<4x32xf32>
    %cst_12 = arith.constant 1.000000e+00 : f32
    %30 = vector.broadcast %cst_12 : f32 to vector<4x32xf32>
    %31 = arith.addf %30, %29 : vector<4x32xf32>
    %32 = arith.divf %30, %31 : vector<4x32xf32>
    %33 = arith.mulf %24, %12 : vector<4x32xf32>
    %34 = arith.mulf %18, %26 : vector<4x32xf32>
    %35 = arith.addf %33, %34 : vector<4x32xf32>
    %36 = math.tanh %35 : vector<4x32xf32>
    %37 = arith.mulf %32, %36 : vector<4x32xf32>
    %38 = vector.extract_strided_slice %10 {offsets = [0, 128], sizes = [4, 128], strides = [1, 1]} : vector<4x256xf32> to vector<4x128xf32>
    %39 = vector.extract_strided_slice %2 {offsets = [0, 32], sizes = [4, 32], strides = [1, 1]} : vector<4x128xf32> to vector<4x32xf32>
    %40 = vector.extract_strided_slice %38 {offsets = [0, 0], sizes = [4, 32], strides = [1, 1]} : vector<4x128xf32> to vector<4x32xf32>
    %41 = arith.negf %40 : vector<4x32xf32>
    %42 = math.exp %41 : vector<4x32xf32>
    %cst_13 = arith.constant 1.000000e+00 : f32
    %43 = vector.broadcast %cst_13 : f32 to vector<4x32xf32>
    %44 = arith.addf %43, %42 : vector<4x32xf32>
    %45 = arith.divf %43, %44 : vector<4x32xf32>
    %46 = vector.extract_strided_slice %38 {offsets = [0, 32], sizes = [4, 32], strides = [1, 1]} : vector<4x128xf32> to vector<4x32xf32>
    %47 = arith.negf %46 : vector<4x32xf32>
    %48 = math.exp %47 : vector<4x32xf32>
    %cst_14 = arith.constant 1.000000e+00 : f32
    %49 = vector.broadcast %cst_14 : f32 to vector<4x32xf32>
    %50 = arith.addf %49, %48 : vector<4x32xf32>
    %51 = arith.divf %49, %50 : vector<4x32xf32>
    %52 = vector.extract_strided_slice %38 {offsets = [0, 64], sizes = [4, 32], strides = [1, 1]} : vector<4x128xf32> to vector<4x32xf32>
    %53 = math.tanh %52 : vector<4x32xf32>
    %54 = vector.extract_strided_slice %38 {offsets = [0, 96], sizes = [4, 32], strides = [1, 1]} : vector<4x128xf32> to vector<4x32xf32>
    %55 = arith.negf %54 : vector<4x32xf32>
    %56 = math.exp %55 : vector<4x32xf32>
    %cst_15 = arith.constant 1.000000e+00 : f32
    %57 = vector.broadcast %cst_15 : f32 to vector<4x32xf32>
    %58 = arith.addf %57, %56 : vector<4x32xf32>
    %59 = arith.divf %57, %58 : vector<4x32xf32>
    %60 = arith.mulf %51, %39 : vector<4x32xf32>
    %61 = arith.mulf %45, %53 : vector<4x32xf32>
    %62 = arith.addf %60, %61 : vector<4x32xf32>
    %63 = math.tanh %62 : vector<4x32xf32>
    %64 = arith.mulf %59, %63 : vector<4x32xf32>
    %65 = tpu.concatenate %37, %64 in 1 : vector<4x32xf32>, vector<4x32xf32> -> vector<4x64xf32>
    %66 = vector.extract_strided_slice %1 {offsets = [0, 64], sizes = [4, 64], strides = [1, 1]} : vector<4x128xf32> to vector<4x64xf32>
    %67 = tpu.concatenate %65, %66 in 1 : vector<4x64xf32>, vector<4x64xf32> -> vector<4x128xf32>
    %c1 = arith.constant 1 : index
    %c0_16 = arith.constant 0 : index
    %c0_17 = arith.constant 0 : index
    %68 = vector.load %arg4[%c1, %c0_16, %c0_17] : memref<2x128x256xf32, #tpu.memory_space<vmem>>, vector<1x128x256xf32>
    %69 = vector.shape_cast %68 : vector<1x128x256xf32> to vector<128x256xf32>
    %cst_18 = arith.constant dense<0.000000e+00> : vector<4x256xf32>
    %70 = tpu.matmul %67, %69, %cst_18 {dimension_numbers = #tpu.dot_dimension_numbers<[1], [0], [0], [1], [0, 0, 1, 1], [], []>} : vector<4x128xf32>, vector<128x256xf32>, vector<4x256xf32> -> vector<4x256xf32>
    %c1_19 = arith.constant 1 : index
    %c0_20 = arith.constant 0 : index
    %71 = vector.load %arg5[%c1_19, %c0_20] : memref<2x256xf32, #tpu.memory_space<vmem>>, vector<1x256xf32>
    %72 = vector.broadcast %71 : vector<1x256xf32> to vector<4x256xf32>
    %73 = arith.addf %70, %72 : vector<4x256xf32>
    %74 = vector.extract_strided_slice %73 {offsets = [0, 0], sizes = [4, 128], strides = [1, 1]} : vector<4x256xf32> to vector<4x128xf32>
    %75 = vector.extract_strided_slice %2 {offsets = [0, 64], sizes = [4, 32], strides = [1, 1]} : vector<4x128xf32> to vector<4x32xf32>
    %76 = vector.extract_strided_slice %74 {offsets = [0, 0], sizes = [4, 32], strides = [1, 1]} : vector<4x128xf32> to vector<4x32xf32>
    %77 = arith.negf %76 : vector<4x32xf32>
    %78 = math.exp %77 : vector<4x32xf32>
    %cst_21 = arith.constant 1.000000e+00 : f32
    %79 = vector.broadcast %cst_21 : f32 to vector<4x32xf32>
    %80 = arith.addf %79, %78 : vector<4x32xf32>
    %81 = arith.divf %79, %80 : vector<4x32xf32>
    %82 = vector.extract_strided_slice %74 {offsets = [0, 32], sizes = [4, 32], strides = [1, 1]} : vector<4x128xf32> to vector<4x32xf32>
    %83 = arith.negf %82 : vector<4x32xf32>
    %84 = math.exp %83 : vector<4x32xf32>
    %cst_22 = arith.constant 1.000000e+00 : f32
    %85 = vector.broadcast %cst_22 : f32 to vector<4x32xf32>
    %86 = arith.addf %85, %84 : vector<4x32xf32>
    %87 = arith.divf %85, %86 : vector<4x32xf32>
    %88 = vector.extract_strided_slice %74 {offsets = [0, 64], sizes = [4, 32], strides = [1, 1]} : vector<4x128xf32> to vector<4x32xf32>
    %89 = math.tanh %88 : vector<4x32xf32>
    %90 = vector.extract_strided_slice %74 {offsets = [0, 96], sizes = [4, 32], strides = [1, 1]} : vector<4x128xf32> to vector<4x32xf32>
    %91 = arith.negf %90 : vector<4x32xf32>
    %92 = math.exp %91 : vector<4x32xf32>
    %cst_23 = arith.constant 1.000000e+00 : f32
    %93 = vector.broadcast %cst_23 : f32 to vector<4x32xf32>
    %94 = arith.addf %93, %92 : vector<4x32xf32>
    %95 = arith.divf %93, %94 : vector<4x32xf32>
    %96 = arith.mulf %87, %75 : vector<4x32xf32>
    %97 = arith.mulf %81, %89 : vector<4x32xf32>
    %98 = arith.addf %96, %97 : vector<4x32xf32>
    %99 = math.tanh %98 : vector<4x32xf32>
    %100 = arith.mulf %95, %99 : vector<4x32xf32>
    %101 = vector.extract_strided_slice %73 {offsets = [0, 128], sizes = [4, 128], strides = [1, 1]} : vector<4x256xf32> to vector<4x128xf32>
    %102 = vector.extract_strided_slice %2 {offsets = [0, 96], sizes = [4, 32], strides = [1, 1]} : vector<4x128xf32> to vector<4x32xf32>
    %103 = vector.extract_strided_slice %101 {offsets = [0, 0], sizes = [4, 32], strides = [1, 1]} : vector<4x128xf32> to vector<4x32xf32>
    %104 = arith.negf %103 : vector<4x32xf32>
    %105 = math.exp %104 : vector<4x32xf32>
    %cst_24 = arith.constant 1.000000e+00 : f32
    %106 = vector.broadcast %cst_24 : f32 to vector<4x32xf32>
    %107 = arith.addf %106, %105 : vector<4x32xf32>
    %108 = arith.divf %106, %107 : vector<4x32xf32>
    %109 = vector.extract_strided_slice %101 {offsets = [0, 32], sizes = [4, 32], strides = [1, 1]} : vector<4x128xf32> to vector<4x32xf32>
    %110 = arith.negf %109 : vector<4x32xf32>
    %111 = math.exp %110 : vector<4x32xf32>
    %cst_25 = arith.constant 1.000000e+00 : f32
    %112 = vector.broadcast %cst_25 : f32 to vector<4x32xf32>
    %113 = arith.addf %112, %111 : vector<4x32xf32>
    %114 = arith.divf %112, %113 : vector<4x32xf32>
    %115 = vector.extract_strided_slice %101 {offsets = [0, 64], sizes = [4, 32], strides = [1, 1]} : vector<4x128xf32> to vector<4x32xf32>
    %116 = math.tanh %115 : vector<4x32xf32>
    %117 = vector.extract_strided_slice %101 {offsets = [0, 96], sizes = [4, 32], strides = [1, 1]} : vector<4x128xf32> to vector<4x32xf32>
    %118 = arith.negf %117 : vector<4x32xf32>
    %119 = math.exp %118 : vector<4x32xf32>
    %cst_26 = arith.constant 1.000000e+00 : f32
    %120 = vector.broadcast %cst_26 : f32 to vector<4x32xf32>
    %121 = arith.addf %120, %119 : vector<4x32xf32>
    %122 = arith.divf %120, %121 : vector<4x32xf32>
    %123 = arith.mulf %114, %102 : vector<4x32xf32>
    %124 = arith.mulf %108, %116 : vector<4x32xf32>
    %125 = arith.addf %123, %124 : vector<4x32xf32>
    %126 = math.tanh %125 : vector<4x32xf32>
    %127 = arith.mulf %122, %126 : vector<4x32xf32>
    %128 = tpu.concatenate %100, %127 in 1 : vector<4x32xf32>, vector<4x32xf32> -> vector<4x64xf32>
    %129 = tpu.concatenate %65, %128 in 1 : vector<4x64xf32>, vector<4x64xf32> -> vector<4x128xf32>
    %c0_27 = arith.constant 0 : index
    %c0_28 = arith.constant 0 : index
    %130 = vector.load %arg10[%c0_27, %c0_28] : memref<4x128xf32, #tpu.memory_space<vmem>>, vector<4x128xf32>
    tpu.vector_store %arg10[%c0_27, %c0_28], %129 {strides = array<i32>} : memref<4x128xf32, #tpu.memory_space<vmem>>, vector<4x128xf32>,
    %131 = tpu.concatenate %35, %62, %98, %125 in 1 : vector<4x32xf32>, vector<4x32xf32>, vector<4x32xf32>, vector<4x32xf32> -> vector<4x128xf32>
    %c0_29 = arith.constant 0 : index
    %c0_30 = arith.constant 0 : index
    %132 = vector.load %arg11[%c0_29, %c0_30] : memref<4x128xf32, #tpu.memory_space<vmem>>, vector<4x128xf32>
    tpu.vector_store %arg11[%c0_29, %c0_30], %131 {strides = array<i32>} : memref<4x128xf32, #tpu.memory_space<vmem>>, vector<4x128xf32>,
    %c0_31 = arith.constant 0 : index
    %c0_32 = arith.constant 0 : index
    %c0_33 = arith.constant 0 : index
    %133 = vector.load %arg1[%c0_31, %c0_32, %c0_33] : memref<4x8x32xf32, #tpu.memory_space<vmem>>, vector<4x8x32xf32>
    %c0_34 = arith.constant 0 : index
    %c0_35 = arith.constant 0 : index
    %134 = vector.load %arg6[%c0_34, %c0_35] : memref<64x64xf32, #tpu.memory_space<vmem>>, vector<64x64xf32>
    %cst_36 = arith.constant dense<0.000000e+00> : vector<4x64xf32>
    %135 = tpu.matmul %128, %134, %cst_36 {dimension_numbers = #tpu.dot_dimension_numbers<[1], [0], [0], [1], [0, 0, 1, 1], [], []>} : vector<4x64xf32>, vector<64x64xf32>, vector<4x64xf32> -> vector<4x64xf32>
    %136 = vector.extract_strided_slice %135 {offsets = [0, 0], sizes = [4, 32], strides = [1, 1]} : vector<4x64xf32> to vector<4x32xf32>
    %137 = vector.extract_strided_slice %135 {offsets = [0, 32], sizes = [4, 32], strides = [1, 1]} : vector<4x64xf32> to vector<4x32xf32>
    %c0_37 = arith.constant 0 : index
    %c0_38 = arith.constant 0 : index
    %138 = vector.load %arg8[%c0_37, %c0_38] : memref<1x160xf32, #tpu.memory_space<vmem>>, vector<1x64xf32>
    %139 = vector.broadcast %138 : vector<1x64xf32> to vector<4x64xf32>
    %140 = arith.mulf %128, %139 : vector<4x64xf32>
    %cst_39 = arith.constant dense<0.000000e+00> : vector<4xf32>
    %141 = vector.multi_reduction <add>, %140, %cst_39 [1] : vector<4x64xf32> to vector<4xf32>
    %142 = vector.shape_cast %141 : vector<4xf32> to vector<4x1xf32>
    %143 = vector.shape_cast %136 : vector<4x32xf32> to vector<4x1x32xf32>
    %144 = vector.broadcast %143 : vector<4x1x32xf32> to vector<4x8x32xf32>
    %145 = arith.mulf %144, %133 : vector<4x8x32xf32>
    %cst_40 = arith.constant dense<0.000000e+00> : vector<4x8xf32>
    %146 = vector.multi_reduction <add>, %145, %cst_40 [2] : vector<4x8x32xf32> to vector<4x8xf32>
    %147 = vector.broadcast %142 : vector<4x1xf32> to vector<4x8xf32>
    %148 = arith.addf %146, %147 : vector<4x8xf32>
    %cst_41 = arith.constant dense<0xFF800000> : vector<4xf32>
    %149 = vector.multi_reduction <maximumf>, %148, %cst_41 [1] : vector<4x8xf32> to vector<4xf32>
    %150 = vector.shape_cast %149 : vector<4xf32> to vector<4x1xf32>
    %151 = vector.broadcast %150 : vector<4x1xf32> to vector<4x8xf32>
    %152 = arith.subf %148, %151 : vector<4x8xf32>
    %153 = math.exp %152 : vector<4x8xf32>
    %cst_42 = arith.constant dense<0.000000e+00> : vector<4xf32>
    %154 = vector.multi_reduction <add>, %153, %cst_42 [1] : vector<4x8xf32> to vector<4xf32>
    %155 = vector.shape_cast %154 : vector<4xf32> to vector<4x1xf32>
    %156 = tpu.reciprocal %155 : vector<4x1xf32> -> vector<4x1xf32>
    %157 = vector.broadcast %156 : vector<4x1xf32> to vector<4x8xf32>
    %158 = arith.mulf %153, %157 : vector<4x8xf32>
    %c0_43 = arith.constant 0 : index
    %c0_44 = arith.constant 0 : index
    %159 = vector.load %arg12[%c0_43, %c0_44] : memref<4x8xf32, #tpu.memory_space<vmem>>, vector<4x8xf32>
    tpu.vector_store %arg12[%c0_43, %c0_44], %158 {strides = array<i32>} : memref<4x8xf32, #tpu.memory_space<vmem>>, vector<4x8xf32>,
    %160 = vector.shape_cast %158 : vector<4x8xf32> to vector<4x8x1xf32>
    %161 = vector.broadcast %160 : vector<4x8x1xf32> to vector<4x8x32xf32>
    %162 = arith.mulf %161, %133 : vector<4x8x32xf32>
    %cst_45 = arith.constant dense<0.000000e+00> : vector<4x32xf32>
    %163 = vector.multi_reduction <add>, %162, %cst_45 [1] : vector<4x8x32xf32> to vector<4x32xf32>
    %c0_46 = arith.constant 0 : index
    %c0_47 = arith.constant 0 : index
    %164 = vector.load %arg7[%c0_46, %c0_47] : memref<32x96xf32, #tpu.memory_space<vmem>>, vector<32x32xf32>
    %c0_48 = arith.constant 0 : index
    %c32 = arith.constant 32 : index
    %165 = vector.load %arg7[%c0_48, %c32] : memref<32x96xf32, #tpu.memory_space<vmem>>, vector<32x64xf32>
    %c0_49 = arith.constant 0 : index
    %c64 = arith.constant 64 : index
    %166 = vector.load %arg8[%c0_49, %c64] : memref<1x160xf32, #tpu.memory_space<vmem>>, vector<1x32xf32>
    %c0_50 = arith.constant 0 : index
    %c96 = arith.constant 96 : index
    %167 = vector.load %arg8[%c0_50, %c96] : memref<1x160xf32, #tpu.memory_space<vmem>>, vector<1x64xf32>
    %cst_51 = arith.constant dense<0.000000e+00> : vector<4x32xf32>
    %168 = tpu.matmul %163, %164, %cst_51 {dimension_numbers = #tpu.dot_dimension_numbers<[1], [0], [0], [1], [0, 0, 1, 1], [], []>} : vector<4x32xf32>, vector<32x32xf32>, vector<4x32xf32> -> vector<4x32xf32>
    %169 = arith.addf %137, %168 : vector<4x32xf32>
    %170 = vector.broadcast %166 : vector<1x32xf32> to vector<4x32xf32>
    %171 = arith.addf %169, %170 : vector<4x32xf32>
    %172 = math.tanh %171 : vector<4x32xf32>
    %cst_52 = arith.constant dense<0.000000e+00> : vector<4x64xf32>
    %173 = tpu.matmul %172, %165, %cst_52 {dimension_numbers = #tpu.dot_dimension_numbers<[1], [0], [0], [1], [0, 0, 1, 1], [], []>} : vector<4x32xf32>, vector<32x64xf32>, vector<4x64xf32> -> vector<4x64xf32>
    %174 = vector.broadcast %167 : vector<1x64xf32> to vector<4x64xf32>
    %175 = arith.addf %173, %174 : vector<4x64xf32>
    %c0_53 = arith.constant 0 : index
    %c0_54 = arith.constant 0 : index
    %176 = vector.load %arg9[%c0_53, %c0_54] : memref<4x64xf32, #tpu.memory_space<vmem>>, vector<4x64xf32>
    tpu.vector_store %arg9[%c0_53, %c0_54], %175 {strides = array<i32>} : memref<4x64xf32, #tpu.memory_space<vmem>>, vector<4x64xf32>,
    return
  }
}

</mosaic_0001>

<bundles_post_ra>
// kernel: tpu_custom_call.1
= control target key start
LH: loop header
LB: loop body
LE: loop exit
PB: predicated region body
PF: predicated region fallthrough
CT: control target
= control target key end

     0   :  { %18 = vsyncpa [#allocation3], 0  ;;  %s2042_s0 = inlined_call_operand.hbm [shape: f32[4,32], index: 0, kind: input, shape index: {}]   ;;  %s2043_s1 = inlined_call_operand.hbm [shape: f32[4,8,32], index: 1, kind: input, shape index: {}]   ;;  %s2044_s2 = inlined_call_operand.vmem [shape: f32[4,128], index: 2, kind: input, shape index: {}]   ;;  %s2045_s3 = inlined_call_operand.vmem [shape: f32[4,128], index: 3, kind: input, shape index: {}]   ;;  %s2046_s4 = inlined_call_operand.hbm [shape: f32[2,128,256], index: 4, kind: input, shape index: {}]   ;;  %s2047_s5 = inlined_call_operand.vmem [shape: f32[2,256], index: 5, kind: input, shape index: {}]   ;;  %s2048_s6 = inlined_call_operand.hbm [shape: f32[64,64], index: 6, kind: input, shape index: {}]   ;;  %s2049_s7 = inlined_call_operand.hbm [shape: f32[32,96], index: 7, kind: input, shape index: {}]   ;;  %s2050_s8 = inlined_call_operand.vmem [shape: f32[1,160], index: 8, kind: input, shape index: {}]   ;;  %s2051_s9 = inlined_call_operand.hbm [shape: f32[4,64], index: 9, kind: output, shape index: {0}]   ;;  %s2052_s10 = inlined_call_operand.hbm [shape: f32[4,128], index: 10, kind: output, shape index: {1}]   ;;  %s2053_s11 = inlined_call_operand.hbm [shape: f32[4,128], index: 11, kind: output, shape index: {2}]   ;;  %s2054_s12 = inlined_call_operand.hbm [shape: f32[4,8], index: 12, kind: output, shape index: {3}]  }
   0x1   :  { %19 = vsyncpa [#allocation6], 0 }
   0x2   :  { %20 = vsyncpa [#allocation9], 0 }
   0x3   :  { %21 = vsyncpa [#allocation4], 0 }
   0x4   :  { %22 = vsyncpa [#allocation13], 0 }
   0x5   :  { %23 = vsyncpa [#allocation16], 0  ;;  %s1608_s21 = smov [#allocation5]   ;;  %s1398_s25 = scalar_lea.hbm %s2043_s1, 512 }
   0x6   :  { %s39_s22 = sshll.u32 %s1608_s21, 4  ;;  %p1399_p0 = scmp.ne.s32.totalorder %s2043_s1, %s1398_s25  ;;  %s40_s22 = int_to_ptr.vmem [resolvable:$true] %s39_s22 }
   0x7   :  { %p1402_p1 = scmp.lt.u32.totalorder %s1398_s25, %s2043_s1 }
   0x9   :  { %p1404_p2 = pnand %p1402_p1, %p1399_p0 }
   0xb   :  { %1407 = shalt.err (!%p1404_p2)
}
   0xc   :  { %s1408_s30 = scalar_lea.vmem %s40_s22, 512  ;;  %p1413_p4 = scmp.lt.s32.totalorder %s40_s22, %s40_s22 }
   0xd   :  { %p1409_p3 = scmp.ne.s32.totalorder %s40_s22, %s1408_s30  ;;  %p1414_p5 = scmp.lt.s32.totalorder %s1408_s30, %s1408_s30 }
   0xf   :  { %p1415_p6 = por %p1414_p5, %p1413_p4 }
  0x11   :  { %p1416_p7 = pnand %p1415_p6, %p1409_p3 }
  0x13   :  { %1419 = shalt.err (!%p1416_p7)
}
  0x14   :  { %s1609_s13 = smov 128   ;;  %s1610_s14 = smov 8  }
  0x15   :  { %45 = dma.hbm_to_vmem [thread:$0]  %s2043_s1, 512, %s40_s22, [#allocation6], %s1609_s13, %s1609_s13, %s1610_s14  }
  0x16   :  { %s1611_s17 = smov [#allocation8]   ;;  %s1612_s19 = smov [#allocation2]  }
  0x17   :  { %s69_s18 = sshll.u32 %s1611_s17, 4  ;;  %s30_s20 = sshll.u32 %s1612_s19, 4  ;;  %s70_s18 = int_to_ptr.vmem [resolvable:$true] %s69_s18  ;;  %s31_s20 = int_to_ptr.vmem [resolvable:$true] %s30_s20 }
  0x18   :  { %s1420_s24 = scalar_lea.hbm %s2048_s6, 1024 }
  0x19   :  { %p1421_p8 = scmp.ne.s32.totalorder %s2048_s6, %s1420_s24  ;;  %p1424_p9 = scmp.lt.u32.totalorder %s1420_s24, %s2048_s6 }
  0x1b   :  { %p1426_p10 = pnand %p1424_p9, %p1421_p8 }
  0x1d   :  { %1429 = shalt.err (!%p1426_p10)
}
  0x1e   :  { %s1430_s1 = scalar_lea.vmem %s70_s18, 1024  ;;  %p1435_p12 = scmp.lt.s32.totalorder %s70_s18, %s70_s18 }
  0x1f   :  { %p1431_p11 = scmp.ne.s32.totalorder %s70_s18, %s1430_s1  ;;  %p1436_p13 = scmp.lt.s32.totalorder %s1430_s1, %s1430_s1 }
  0x21   :  { %p1437_p0 = por %p1436_p13, %p1435_p12 }
  0x23   :  { %p1438_p1 = pnand %p1437_p0, %p1431_p11 }
  0x25   :  { %1441 = shalt.err (!%p1438_p1)
}
  0x26   :  { %75 = dma.hbm_to_vmem [thread:$0]  %s2048_s6, 1024, %s70_s18, [#allocation9], %s1609_s13, %s1609_s13, %s1610_s14  }
  0x27   :  { %s1442_s16 = scalar_lea.hbm %s2042_s0, 64 }
  0x28   :  { %p1443_p2 = scmp.ne.s32.totalorder %s2042_s0, %s1442_s16  ;;  %p1446_p3 = scmp.lt.u32.totalorder %s1442_s16, %s2042_s0 }
  0x2a   :  { %p1448_p4 = pnand %p1446_p3, %p1443_p2 }
  0x2c   :  { %1451 = shalt.err (!%p1448_p4)
}
  0x2d   :  { %s1452_s24 = scalar_lea.vmem %s31_s20, 64  ;;  %p1457_p6 = scmp.lt.s32.totalorder %s31_s20, %s31_s20 }
  0x2e   :  { %p1453_p5 = scmp.ne.s32.totalorder %s31_s20, %s1452_s24  ;;  %p1458_p7 = scmp.lt.s32.totalorder %s1452_s24, %s1452_s24 }
  0x30   :  { %p1459_p8 = por %p1458_p7, %p1457_p6 }
  0x32   :  { %p1460_p9 = pnand %p1459_p8, %p1453_p5 }
  0x34   :  { %1463 = shalt.err (!%p1460_p9)
}
  0x35   :  { %33 = dma.hbm_to_vmem [thread:$0]  %s2042_s0, 64, %s31_s20, [#allocation3]  }
  0x36   :  { %s1613_s25 = smov [#allocation7]   ;;  %s1464_s1 = scalar_lea.hbm %s2046_s4, 8192 }
  0x37   :  { %s55_s26 = sshll.u32 %s1613_s25, 4  ;;  %p1465_p10 = scmp.ne.s32.totalorder %s2046_s4, %s1464_s1  ;;  %s56_s26 = int_to_ptr.vmem [resolvable:$true] %s55_s26 }
  0x38   :  { %p1468_p11 = scmp.lt.u32.totalorder %s1464_s1, %s2046_s4 }
  0x3a   :  { %p1470_p12 = pnand %p1468_p11, %p1465_p10 }
  0x3c   :  { %1473 = shalt.err (!%p1470_p12)
}
  0x3d   :  { %s1474_s16 = scalar_lea.vmem %s56_s26, 8192  ;;  %p1479_p0 = scmp.lt.s32.totalorder %s56_s26, %s56_s26 }
  0x3e   :  { %p1475_p13 = scmp.ne.s32.totalorder %s56_s26, %s1474_s16  ;;  %p1480_p1 = scmp.lt.s32.totalorder %s1474_s16, %s1474_s16 }
  0x40   :  { %p1481_p2 = por %p1480_p1, %p1479_p0 }
  0x42   :  { %p1482_p3 = pnand %p1481_p2, %p1475_p13 }
  0x44   :  { %1485 = shalt.err (!%p1482_p3)
}
  0x45   :  { %s1614_s0 = smov 256   ;;  %s1615_s20 = smov 16  }
  0x46   :  { %61 = dma.hbm_to_vmem [thread:$0]  %s2046_s4, 8192, %s56_s26, [#allocation6], %s1614_s0, %s1614_s0, %s1615_s20  }
  0x47   :  { %s1616_s21 = smov [#allocation10]   ;;  %s1486_s18 = scalar_lea.hbm %s2049_s7, 512 }
  0x48   :  { %s81_s23 = sshll.u32 %s1616_s21, 4  ;;  %p1487_p4 = scmp.ne.s32.totalorder %s2049_s7, %s1486_s18  ;;  %s82_s23 = int_to_ptr.vmem [resolvable:$true] %s81_s23 }
  0x49   :  { %p1490_p5 = scmp.lt.u32.totalorder %s1486_s18, %s2049_s7 }
  0x4b   :  { %p1492_p6 = pnand %p1490_p5, %p1487_p4 }
  0x4d   :  { %1495 = shalt.err (!%p1492_p6)
}
  0x4e   :  { %s1496_s22 = scalar_lea.vmem %s82_s23, 512  ;;  %p1501_p8 = scmp.lt.s32.totalorder %s82_s23, %s82_s23 }
  0x4f   :  { %p1497_p7 = scmp.ne.s32.totalorder %s82_s23, %s1496_s22  ;;  %p1502_p9 = scmp.lt.s32.totalorder %s1496_s22, %s1496_s22 }
  0x51   :  { %p1503_p10 = por %p1502_p9, %p1501_p8 }
  0x53   :  { %p1504_p11 = pnand %p1503_p10, %p1497_p7 }
  0x55   :  { %1507 = shalt.err (!%p1504_p11)
}
  0x56   :  { %87 = dma.hbm_to_vmem [thread:$0]  %s2049_s7, 512, %s82_s23, [#allocation9], %s1609_s13, %s1609_s13, %s1610_s14  }
  0x57   :  { %1596 = dma.done.wait [#allocation3], 64  }
  0x58   :  { %1597 = vsyncadd [#allocation3], 4294967232 }
  0x59   :  { %1598 = dma.done.wait [#allocation6], 8704  }
  0x5a   :  { %1599 = vsyncadd [#allocation6], 4294958592 }
  0x5b   :  { %1600 = dma.done.wait [#allocation9], 1536  }
  0x5c   :  { %1601 = vsyncadd [#allocation9], 4294965760  ;;  %v1617_v0 = vmov 0.0   ;;  %v1768_v1 = vld [vmem:[%s2044_s2] sm:$0xf]  ;;  %v121_v3 = vld [vmem:[#allocation7 + $0x8] sm:$0xff]  ;;  %v154_v56 = vlaneseq }
  0x5d   :  { %228 = vmatprep.mubr.f32.mxu0 %v1617_v0  ;;  %408 = vmatprep.mubr.f32.mxu1 %v1617_v0  ;;  %v1770_v2 = vld [vmem:[#allocation2] sm:$0xf]  ;;  %s1618_s7 = smov 32   ;;  %v120_v5 = vld [vmem:[#allocation7] sm:$0xff]  ;;  %v122_v6 = vld [vmem:[#allocation7 + $0x10] sm:$0xff]  ;;  %s1619_s2 = smov 96  }
  0x5e   :  { %109 = vrot.lane.b32.xlu0 %v1768_v1, %s1618_s7  ;;  %v123_v4 = vld [vmem:[#allocation7 + $0x18] sm:$0xff]  ;;  %v1235_v8 = vpack.c.bf16 %v122_v6, %v120_v5  ;;  %v125_v9 = vld [vmem:[#allocation7 + $0x28] sm:$0xff]  ;;  %v124_v11 = vld [vmem:[#allocation7 + $0x20] sm:$0xff]  ;;  %vm116_vm0 = vcmask 261120   ;;  %vm118_vm1 = vcmask 785408   ;;  %v1787_v57 = vshrl.u32 %v154_v56, 7 }
  0x5f   :  { %v1233_v7 = vpack.c.bf16 %v123_v4, %v121_v3  ;;  %v127_v10 = vld [vmem:[#allocation7 + $0x38] sm:$0xff]  ;;  %v126_v13 = vld [vmem:[#allocation7 + $0x30] sm:$0xff]  ;;  %v129_v14 = vld [vmem:[#allocation7 + $0x48] sm:$0xff]  ;;  %s1620_s16 = smov 64   ;;  %vm296_vm2 = vcmask 523264   ;;  %vm1622_vm3 = vmmov 0  }
  0x60   :  { %v1237_v12 = vpack.c.bf16 %v127_v10, %v125_v9  ;;  %v131_v15 = vld [vmem:[#allocation7 + $0x58] sm:$0xff]  ;;  %v1239_v16 = vpack.c.bf16 %v126_v13, %v124_v11  ;;  %v128_v18 = vld [vmem:[#allocation7 + $0x40] sm:$0xff]  ;;  %v130_v19 = vld [vmem:[#allocation7 + $0x50] sm:$0xff]  ;;  %v1790_v58 = vsub.s32 0, %v1787_v57  ;;  %v1796_v60 = vsub.s32 1, %v1787_v57 }
  0x61   :  { %1234 = vmatprep.subr.bf16.mxu0 %v1233_v7  ;;  %v1241_v17 = vpack.c.bf16 %v131_v15, %v129_v14  ;;  %v133_v20 = vld [vmem:[#allocation7 + $0x68] sm:$0xff]  ;;  %v135_v21 = vld [vmem:[#allocation7 + $0x78] sm:$0xff]  ;;  %v1243_v22 = vpack.c.bf16 %v130_v19, %v128_v18  ;;  %v132_v24 = vld [vmem:[#allocation7 + $0x60] sm:$0xff]  ;;  %vm592_vm4 = vcmask 519168   ;;  %vm716_vm5 = vcmask 1041409  }
  0x62   :  { %113 = vrot.lane.b32.xlu0 %v1770_v2, %s1619_s2  ;;  %1236 = vmatpush1.bf16.msra.mxu0 %v1235_v8  ;;  %v1245_v23 = vpack.c.bf16 %v135_v21, %v133_v20  ;;  %v134_v25 = vld [vmem:[#allocation7 + $0x70] sm:$0xff]  ;;  %v137_v26 = vld [vmem:[#allocation7 + $0x88] sm:$0xff]  ;;  %v139_v27 = vld [vmem:[#allocation7 + $0x98] sm:$0xff]  ;;  %vm718_vm6 = vcmask 1042434   ;;  %vm720_vm7 = vcmask 1043459   ;;  %vm723_vm8 = vcmask 60416  }
  0x63   :  { %1238 = vmatprep.subr.bf16.mxu0 %v1237_v12  ;;  %v1779_v28 = vld [vmem:[%s2045_s3] sm:$0xf]  ;;  %v1247_v29 = vpack.c.bf16 %v134_v25, %v132_v24  ;;  %v1249_v30 = vpack.c.bf16 %v139_v27, %v137_v26  ;;  %v136_v31 = vld [vmem:[#allocation7 + $0x80] sm:$0xff]  ;;  %v138_v32 = vld [vmem:[#allocation7 + $0x90] sm:$0xff] }
  0x64   :  { %v141_v33 = vld [vmem:[#allocation7 + $0xa8] sm:$0xff]  ;;  %v143_v34 = vld [vmem:[#allocation7 + $0xb8] sm:$0xff]  ;;  %v1251_v35 = vpack.c.bf16 %v138_v32, %v136_v31  ;;  %v140_v37 = vld [vmem:[#allocation7 + $0xa0] sm:$0xff] }
  0x65   :  { %v1253_v36 = vpack.c.bf16 %v143_v34, %v141_v33  ;;  %v142_v38 = vld [vmem:[#allocation7 + $0xb0] sm:$0xff]  ;;  %v145_v39 = vld [vmem:[#allocation7 + $0xc8] sm:$0xff]  ;;  %v147_v40 = vld [vmem:[#allocation7 + $0xd8] sm:$0xff] }
  0x66   :  { %1240 = vmatpush1.bf16.msra.mxu0 %v1239_v16  ;;  %243 = vrot.lane.b32.xlu0 %v1779_v28, %s1618_s7  ;;  %v1255_v41 = vpack.c.bf16 %v142_v38, %v140_v37  ;;  %v1257_v42 = vpack.c.bf16 %v147_v40, %v145_v39  ;;  %v144_v43 = vld [vmem:[#allocation7 + $0xc0] sm:$0xff]  ;;  %v146_v44 = vld [vmem:[#allocation7 + $0xd0] sm:$0xff]  ;;  %v149_v45 = vld [vmem:[#allocation7 + $0xe8] sm:$0xff] }
  0x67   :  { %1242 = vmatprep.subr.bf16.mxu0 %v1241_v17  ;;  %v151_v46 = vld [vmem:[#allocation7 + $0xf8] sm:$0xff]  ;;  %v1259_v47 = vpack.c.bf16 %v146_v44, %v144_v43  ;;  %v148_v49 = vld [vmem:[#allocation7 + $0xe0] sm:$0xff]  ;;  %v150_v50 = vld [vmem:[#allocation7 + $0xf0] sm:$0xff] }
  0x68   :  { %v1261_v48 = vpack.c.bf16 %v151_v46, %v149_v45  ;;  %v1263_v51 = vpack.c.bf16 %v150_v50, %v148_v49  ;;  %v152_v59 = vld [vmem:[%s2047_s5] ss:$2 sm:$0x3]  ;;  %v300_v26 = vld [vmem:[#allocation7 + $0x108] sm:$0xff]  ;;  %v301_v31 = vld [vmem:[#allocation7 + $0x110] sm:$0xff] }
  0x69   :  { %v157_v61 = vrot.slane %v152_v59, %v1790_v58  ;;  %v161_v62 = vrot.slane %v152_v59, %v1796_v60  ;;  %v302_v27 = vld [vmem:[#allocation7 + $0x118] sm:$0xff]  ;;  %v304_v32 = vld [vmem:[#allocation7 + $0x128] sm:$0xff]  ;;  %v305_v37 = vld [vmem:[#allocation7 + $0x130] sm:$0xff] }
  0x6a   :  { %1244 = vmatpush1.bf16.msra.mxu0 %v1243_v22  ;;  %v306_v33 = vld [vmem:[#allocation7 + $0x138] sm:$0xff]  ;;  %v308_v38 = vld [vmem:[#allocation7 + $0x148] sm:$0xff]  ;;  %v309_v43 = vld [vmem:[#allocation7 + $0x150] sm:$0xff] }
  0x6b   :  { %1246 = vmatprep.subr.bf16.mxu0 %v1245_v23  ;;  %v310_v39 = vld [vmem:[#allocation7 + $0x158] sm:$0xff]  ;;  %v312_v45 = vld [vmem:[#allocation7 + $0x168] sm:$0xff]  ;;  %v311_v49 = vld [vmem:[#allocation7 + $0x160] sm:$0xff] }
  0x6c   :  { %v314_v46 = vld [vmem:[#allocation7 + $0x178] sm:$0xff]  ;;  %v313_v50 = vld [vmem:[#allocation7 + $0x170] sm:$0xff]  ;;  %v315_v59 = vld [vmem:[#allocation7 + $0x180] sm:$0xff] }
  0x6e   :  { %1248 = vmatpush1.bf16.msra.mxu0 %v1247_v29  ;;  %v299_v29 = vld [vmem:[#allocation7 + $0x100] sm:$0xff] }
  0x6f   :  { %1250 = vmatprep.subr.bf16.mxu0 %v1249_v30  ;;  %v1265_v30 = vpack.c.bf16 %v302_v27, %v300_v26  ;;  %v1267_v34 = vpack.c.bf16 %v301_v31, %v299_v29 }
  0x71   :  { %1266 = vmatprep.subr.bf16.mxu1 %v1265_v30 }
  0x72   :  { %1252 = vmatpush1.bf16.msra.mxu0 %v1251_v35  ;;  %v1269_v35 = vpack.c.bf16 %v306_v33, %v304_v32  ;;  %1268 = vmatpush1.bf16.msra.mxu1 %v1267_v34 }
  0x73   :  { %1254 = vmatprep.subr.bf16.mxu0 %v1253_v36  ;;  %v303_v36 = vld [vmem:[#allocation7 + $0x120] sm:$0xff] }
  0x74   :  { %v1271_v40 = vpack.c.bf16 %v305_v37, %v303_v36  ;;  %1270 = vmatprep.subr.bf16.mxu1 %v1269_v35 }
  0x76   :  { %1256 = vmatpush1.bf16.msra.mxu0 %v1255_v41  ;;  %v1273_v41 = vpack.c.bf16 %v310_v39, %v308_v38  ;;  %1272 = vmatpush1.bf16.msra.mxu1 %v1271_v40 }
  0x77   :  { %1258 = vmatprep.subr.bf16.mxu0 %v1257_v42  ;;  %v307_v42 = vld [vmem:[#allocation7 + $0x140] sm:$0xff] }
  0x78   :  { %1274 = vmatprep.subr.bf16.mxu1 %v1273_v41 }
  0x7a   :  { %1260 = vmatpush1.bf16.msra.mxu0 %v1259_v47  ;;  %v1275_v47 = vpack.c.bf16 %v309_v43, %v307_v42 }
  0x7b   :  { %1262 = vmatprep.subr.bf16.mxu0 %v1261_v48  ;;  %v1277_v48 = vpack.c.bf16 %v314_v46, %v312_v45 }
  0x7c   :  { %1276 = vmatpush1.bf16.msra.mxu1 %v1275_v47 }
  0x7d   :  { %1278 = vmatprep.subr.bf16.mxu1 %v1277_v48 }
  0x7e   :  { %1264 = vmatpush1.bf16.msra.mxu0 %v1263_v51 }
  0xd0   :  { %v110_v52 = vpop.permute.xlu0 %109 }
  0xd1   :  { %v117_v53 = vsel %vm116_vm0, %v1770_v2, %v110_v52  ;;  %v316_v52 = vld [vmem:[#allocation7 + $0x188] sm:$0xff] }
  0xd4   :  { %v114_v54 = vpop.permute.xlu0 %113 }
  0xd5   :  { %v119_v55 = vsel %vm118_vm1, %v117_v53, %v114_v54  ;;  %v318_v53 = vld [vmem:[#allocation7 + $0x198] sm:$0xff]  ;;  %v1279_v54 = vpack.c.bf16 %v313_v50, %v311_v49 }
  0xd6   :  { %229 = vmatmul.mubr.f32.vlgmr.msra.gmra.mrb[0].mxu0 %v119_v55  ;;  %v1281_v55 = vpack.c.bf16 %v318_v53, %v316_v52 }
  0xd7   :  { %1280 = vmatpush1.bf16.msra.mxu1 %v1279_v54  ;;  %1208 = vmatprep.mubr.msk.f32.mxu0 %vm1622_vm3, %v1617_v0 }
  0xd8   :  { %v244_v19 = vpop.permute.xlu0 %243  ;;  %1282 = vmatprep.subr.bf16.mxu1 %v1281_v55 }
 0x1a9   :  { %v230_v63 = vpop.f32.mrb[0].mxu0 }
 0x1aa   :  { %v231_v2 = vadd.f32 %v230_v63, %v157_v61  ;;  %v232_v3 = vpop.f32.mrb[1].mxu0  ;;  %v317_v61 = vld [vmem:[#allocation7 + $0x190] sm:$0xff]  ;;  %v322_v63 = vld [vmem:[#allocation7 + $0x1b8] sm:$0xff] }
 0x1ab   :  { %v233_v4 = vadd.f32 %v232_v3, %v161_v62  ;;  %v320_v62 = vld [vmem:[#allocation7 + $0x1a8] sm:$0xff] }
 0x1ac   :  { %1354 = vtanh.f32 %v231_v2  ;;  %v1163_v7 = vmul.f32 -1.442695, %v231_v2  ;;  %v1283_v2 = vpack.c.bf16 %v317_v61, %v315_v59  ;;  %v1285_v3 = vpack.c.bf16 %v322_v63, %v320_v62  ;;  %v504_v61 = vld [vmem:[#allocation8] sm:$0xff]  ;;  %v505_v62 = vld [vmem:[#allocation8 + $0x8] sm:$0xff]  ;;  %v506_v63 = vld [vmem:[#allocation8 + $0x10] sm:$0xff] }
 0x1ad   :  { %1356 = vtanh.f32 %v233_v4  ;;  %v1164_v8 = vmul.f32 -1.442695, %v233_v4  ;;  %v319_v4 = vld [vmem:[#allocation7 + $0x1a0] sm:$0xff] }
 0x1ae   :  { %1358 = vpow2.f32 %v1163_v7  ;;  %v326_v7 = vld [vmem:[#allocation7 + $0x1d8] sm:$0xff]  ;;  %1284 = vmatpush1.bf16.msra.mxu1 %v1283_v2  ;;  %v1621_v2 = vmov 0.0|0.0  }
 0x1af   :  { %1360 = vpow2.f32 %v1164_v8  ;;  %1286 = vmatprep.subr.bf16.mxu1 %v1285_v3  ;;  %1297 = vmatprep.subr.bf16.mxu0 %v1621_v2  ;;  %v1298_v3 = vpack.c.bf16 %v505_v62, %v504_v61 }
 0x1b1   :  { %1299 = vmatpush3.bf16.msra.mxu0 %v1298_v3 }
 0x1b2   :  { %1300 = vmatprep.subr.bf16.mxu0 %v1621_v2 }
 0x1b6   :  { %v1355_v5 = vpop.eup %1354 }
 0x1b7   :  { %248 = vrot.lane.b32.xlu1 %v1355_v5, %s1620_s16  ;;  %v1357_v6 = vpop.eup %1356  ;;  %v321_v5 = vld [vmem:[#allocation7 + $0x1b0] sm:$0xff] }
 0x1b8   :  { %v1359_v9 = vpop.eup %1358  ;;  %v1287_v8 = vpack.c.bf16 %v321_v5, %v319_v4  ;;  %v507_v4 = vld [vmem:[#allocation8 + $0x18] sm:$0xff] }
 0x1b9   :  { %v238_v10 = vadd.f32 1.0, %v1359_v9  ;;  %v1361_v11 = vpop.eup %1360  ;;  %v1301_v5 = vpack.c.bf16 %v507_v4, %v506_v63  ;;  %v1902_v63 = vsub.s32 2, %v1787_v57 }
 0x1ba   :  { %v266_v12 = vadd.f32 1.0, %v1361_v11  ;;  %v325_v11 = vld [vmem:[#allocation7 + $0x1d0] sm:$0xff]  ;;  %1288 = vmatpush1.bf16.msra.mxu1 %v1287_v8 }
 0x1bb   :  { %272 = vrot.lane.b32.xlu1 %v1357_v6, %s1620_s16  ;;  %1362 = vrcp.f32 %v238_v10  ;;  %v324_v6 = vld [vmem:[#allocation7 + $0x1c8] sm:$0xff]  ;;  %v323_v10 = vld [vmem:[#allocation7 + $0x1c0] sm:$0xff]  ;;  %1302 = vmatpush3.bf16.msra.mxu0 %v1301_v5 }
 0x1bc   :  { %1364 = vrcp.f32 %v266_v12  ;;  %v1289_v9 = vpack.c.bf16 %v326_v7, %v324_v6  ;;  %v1291_v12 = vpack.c.bf16 %v325_v11, %v323_v10  ;;  %v508_v6 = vld [vmem:[#allocation8 + $0x20] sm:$0xff]  ;;  %v509_v7 = vld [vmem:[#allocation8 + $0x28] sm:$0xff]  ;;  %1303 = vmatprep.subr.bf16.mxu0 %v1621_v2  ;;  %v511_v10 = vld [vmem:[#allocation8 + $0x38] sm:$0xff] }
 0x1bd   :  { %v1304_v8 = vpack.c.bf16 %v509_v7, %v508_v6 }
 0x1be   :  { %1290 = vmatprep.subr.bf16.mxu1 %v1289_v9  ;;  %v510_v9 = vld [vmem:[#allocation8 + $0x30] sm:$0xff] }
 0x1bf   :  { %1292 = vmatpush1.bf16.msra.mxu1 %v1291_v12  ;;  %1305 = vmatpush3.bf16.msra.mxu0 %v1304_v8  ;;  %v1907_v8 = vsub.s32 3, %v1787_v57 }
 0x1c0   :  { %1306 = vmatprep.subr.bf16.mxu0 %v1621_v2 }
 0x1c5   :  { %v1802_v13 = vpop.eup %1362 }
 0x1c6   :  { %v1806_v16 = vpop.eup %1364  ;;  %v246_v20 = vmul.f32 %v1802_v13, %v244_v19  ;;  %v329_v19 = vld [vmem:[#allocation7 + $0x1f0] sm:$0xff] }
 0x1c7   :  { %v270_v23 = vmul.f32 %v1806_v16, %v1779_v28 }
 0x229   :  { %v249_v14 = vpop.permute.xlu1 %248 }
 0x22a   :  { %v251_v15 = vmul.f32 %v1802_v13, %v249_v14  ;;  %v328_v14 = vld [vmem:[#allocation7 + $0x1e8] sm:$0xff] }
 0x22c   :  { %253 = vrot.lane.b32.xlu1 %v251_v15, %s1618_s7  ;;  %v330_v15 = vld [vmem:[#allocation7 + $0x1f8] sm:$0xff] }
 0x22d   :  { %v273_v17 = vpop.permute.xlu1 %272 }
 0x22e   :  { %v275_v18 = vmul.f32 %v1806_v16, %v273_v17  ;;  %v327_v17 = vld [vmem:[#allocation7 + $0x1e0] sm:$0xff] }
 0x230   :  { %277 = vrot.lane.b32.xlu0 %v275_v18, %s1618_s7  ;;  %v1293_v18 = vpack.c.bf16 %v330_v15, %v328_v14  ;;  %v1307_v14 = vpack.c.bf16 %v511_v10, %v510_v9 }
 0x232   :  { %1294 = vmatprep.subr.bf16.mxu1 %v1293_v18  ;;  %1308 = vmatpush3.bf16.msra.mxu0 %v1307_v14 }
 0x29e   :  { %v254_v21 = vpop.permute.xlu1 %253 }
 0x29f   :  { %v1811_v22 = vadd.f32 %v254_v21, %v246_v20  ;;  %v1295_v20 = vpack.c.bf16 %v329_v19, %v327_v17 }
 0x2a1   :  { %1366 = vtanh.f32 %v1811_v22  ;;  %1296 = vmatpush1.bf16.msra.mxu1 %v1295_v20 }
 0x2a2   :  { %v278_v24 = vpop.permute.xlu0 %277  ;;  %1309 = vmatprep.subr.bf16.mxu1 %v1621_v2 }
 0x2a3   :  { %v1816_v25 = vadd.f32 %v278_v24, %v270_v23 }
 0x2a5   :  { %1368 = vtanh.f32 %v1816_v25 }
 0x2ab   :  { %v1367_v44 = vpop.eup %1366 }
 0x2ac   :  { %259 = vrot.lane.b32.xlu1 %v1367_v44, %s1620_s16 }
 0x2af   :  { %v1369_v51 = vpop.eup %1368 }
 0x2b0   :  { %283 = vrot.lane.b32.xlu0 %v1369_v51, %s1620_s16 }
 0x31e   :  { %v260_v21 = vpop.permute.xlu1 %259 }
 0x31f   :  { %v262_v23 = vmul.f32 %v1802_v13, %v260_v21  ;;  %v1165_v13 = vld [vmem:[%s2047_s5 + $0x1] ss:$2 sm:$0x3]  ;;  %v1866_v21 = vld [vmem:[%s2050_s8] ss:$0 sm:$0xff] }
 0x320   :  { %v337_v32 = vrot.slane %v1165_v13, %v1790_v58 }
 0x321   :  { %288 = vrot.lane.b32.xlu1 %v262_v23, %s1618_s7 }
 0x322   :  { %v284_v24 = vpop.permute.xlu0 %283 }
 0x323   :  { %v286_v26 = vmul.f32 %v1806_v16, %v284_v24  ;;  %v341_v16 = vrot.slane %v1165_v13, %v1796_v60 }
 0x325   :  { %292 = vrot.lane.b32.xlu0 %v286_v26, %s1620_s16 }
 0x393   :  { %v289_v27 = vpop.permute.xlu1 %288 }
 0x397   :  { %v293_v29 = vpop.permute.xlu0 %292 }
 0x398   :  { %v1826_v30 = vsel %vm116_vm0, %v289_v27, %v293_v29  ;;  %v1623_v29 = vmov 1966171168  }
 0x399   :  { %v297_v31 = vsel %vm296_vm2, %v1826_v30, %v1768_v1 }
 0x39a   :  { %409 = vmatmul.mubr.f32.vlgmr.msra.gmra.mrb[0].mxu1 %v297_v31  ;;  %v598_v31 = vunpack.c.l.s4 %v1623_v29 }
 0x39b   :  { %1219 = vmatprep.mubr.msk.f32.mxu1 %vm1622_vm3, %v1617_v0 }
 0x39c   :  { %v599_v13 = vunpack.c.0.s8 %v598_v31 }
 0x46d   :  { %v410_v33 = vpop.f32.mrb[0].mxu1 }
 0x46e   :  { %v411_v34 = vadd.f32 %v410_v33, %v337_v32  ;;  %v412_v35 = vpop.f32.mrb[1].mxu1  ;;  %v602_v32 = vsub.s32 %v599_v13, %v1787_v57 }
 0x46f   :  { %v413_v36 = vadd.f32 %v412_v35, %v341_v16 }
 0x470   :  { %1370 = vtanh.f32 %v411_v34  ;;  %v1166_v1 = vmul.f32 -1.442695, %v411_v34 }
 0x471   :  { %1372 = vtanh.f32 %v413_v36  ;;  %v1167_v39 = vmul.f32 -1.442695, %v413_v36 }
 0x472   :  { %1374 = vpow2.f32 %v1166_v1 }
 0x473   :  { %1376 = vpow2.f32 %v1167_v39 }
 0x47a   :  { %v1371_v37 = vpop.eup %1370 }
 0x47b   :  { %v1373_v38 = vpop.eup %1372  ;;  %427 = vrot.lane.b32.xlu1 %v1371_v37, %s1620_s16  ;;  %v1880_v37 = vld [vmem:[#allocation5] sm:$0xff] }
 0x47c   :  { %454 = vrot.lane.b32.xlu0 %v1373_v38, %s1620_s16  ;;  %v1375_v40 = vpop.eup %1374 }
 0x47d   :  { %v1377_v41 = vpop.eup %1376  ;;  %v418_v42 = vadd.f32 1.0, %v1375_v40  ;;  %v1883_v40 = vld [vmem:[#allocation5 + $0x10] sm:$0xff] }
 0x47e   :  { %v445_v43 = vadd.f32 1.0, %v1377_v41  ;;  %v1885_v41 = vld [vmem:[#allocation5 + $0x8] sm:$0xff] }
 0x47f   :  { %422 = vrot.lane.b32.xlu1 %v1779_v28, %s1619_s2  ;;  %1378 = vrcp.f32 %v418_v42 }
 0x480   :  { %449 = vrot.lane.b32.xlu0 %v1779_v28, %s1620_s16  ;;  %1380 = vrcp.f32 %v445_v43 }
 0x489   :  { %v1379_v44 = vpop.eup %1378 }
 0x48a   :  { %v1381_v46 = vpop.eup %1380 }
 0x4ed   :  { %v428_v45 = vpop.permute.xlu1 %427 }
 0x4ee   :  { %v430_v47 = vmul.f32 %v1379_v44, %v428_v45  ;;  %v455_v48 = vpop.permute.xlu0 %454 }
 0x4ef   :  { %v457_v49 = vmul.f32 %v1381_v46, %v455_v48 }
 0x4f0   :  { %432 = vrot.lane.b32.xlu1 %v430_v47, %s1618_s7 }
 0x4f1   :  { %459 = vrot.lane.b32.xlu0 %v457_v49, %s1618_s7  ;;  %v423_v28 = vpop.permute.xlu1 %422 }
 0x4f2   :  { %v450_v50 = vpop.permute.xlu0 %449  ;;  %v425_v51 = vmul.f32 %v1379_v44, %v423_v28  ;;  %v1894_v28 = vld [vmem:[#allocation5 + $0x18] sm:$0xff] }
 0x4f3   :  { %v452_v52 = vmul.f32 %v1381_v46, %v450_v50 }
 0x562   :  { %v433_v53 = vpop.permute.xlu1 %432 }
 0x563   :  { %v1844_v54 = vadd.f32 %v433_v53, %v425_v51  ;;  %v460_v55 = vpop.permute.xlu0 %459 }
 0x564   :  { %v1846_v59 = vadd.f32 %v460_v55, %v452_v52  ;;  %v1624_v55 = vmov 0  }
 0x565   :  { %1382 = vtanh.f32 %v1844_v54  ;;  %1342 = vset.pattern.permute.xlu1 %v1624_v55  ;;  %1343 = vset.pattern.permute.xlu0 %v1624_v55 }
 0x566   :  { %1384 = vtanh.f32 %v1846_v59 }
 0x56f   :  { %v1383_v11 = vpop.eup %1382 }
 0x570   :  { %v1385_v12 = vpop.eup %1384  ;;  %438 = vrot.lane.b32.xlu1 %v1383_v11, %s1620_s16 }
 0x571   :  { %465 = vrot.lane.b32.xlu0 %v1385_v12, %s1620_s16 }
 0x5e2   :  { %v439_v15 = vpop.permute.xlu1 %438 }
 0x5e3   :  { %v441_v17 = vmul.f32 %v1379_v44, %v439_v15  ;;  %v466_v18 = vpop.permute.xlu0 %465 }
 0x5e4   :  { %v468_v19 = vmul.f32 %v1381_v46, %v466_v18 }
 0x5e5   :  { %470 = vrot.lane.b32.xlu1 %v441_v17, %s1618_s7  ;;  %v699_v17 = vand.u32 127, %v154_v56 }
 0x5e6   :  { %474 = vrot.lane.b32.xlu0 %v468_v19, %s1620_s16 }
 0x5e7   :  { %v1912_v19 = vsub.s32 %v699_v17, %v1787_v57 }
 0x657   :  { %v471_v20 = vpop.permute.xlu1 %470 }
 0x658   :  { %v475_v23 = vpop.permute.xlu0 %474 }
 0x659   :  { %v1869_v24 = vsel %vm116_vm0, %v471_v20, %v475_v23 }
 0x65a   :  { %1209 = vmatmul.mubr.msk.f32.vlgmr.msra.gmra.mrb[2].mxu0 %vm296_vm2, %v1869_v24  ;;  %v591_v26 = vmul.f32 %v1866_v21, %v1869_v24 }
 0x65c   :  { %v593_v27 = vsel %vm592_vm4, %v591_v26, 0.0 }
 0x65d   :  { %594 = vadd.xlane.f32.xlu1 %v593_v27 }
 0x6ea   :  { %v595_v61 = vpop.xlane.xlu1 %594 }
 0x6eb   :  { %v661_v62 = vrot.slane %v595_v61, %v1790_v58  ;;  %v669_v6 = vrot.slane %v595_v61, %v1902_v63  ;;  %v665_v7 = vrot.slane %v595_v61, %v1796_v60  ;;  %v673_v12 = vrot.slane %v595_v61, %v1907_v8 }
 0x72d   :  { %v1877_v16 = vpop.f32.mrb[2].mxu0 }
 0x72e   :  { %v603_v33 = vrot.slane %v1877_v16, %v602_v32  ;;  %v1210_v34 = vpop.f32.mrb[3].mxu0 }
 0x730   :  { %v604_v35 = vcombine.high %v603_v33, %v603_v33  ;;  %v611_v36 = vrot.slane %v603_v33, %v602_v32 }
 0x732   :  { %v618_v38 = vrot.slane %v604_v35, %v602_v32  ;;  %v619_v1 = vcombine.high %v611_v36, %v611_v36  ;;  %v624_v39 = vrot.slane %v611_v36, %v1790_v58 }
 0x734   :  { %v641_v42 = vmul.f32 %v624_v39, %v1880_v37  ;;  %v632_v43 = vrot.slane %v619_v1, %v1790_v58  ;;  %v628_v44 = vrot.slane %v618_v38, %v1790_v58  ;;  %v620_v45 = vcombine.high %v618_v38, %v618_v38 }
 0x736   :  { %v645_v46 = vsel %vm116_vm0, %v641_v42, 0.0  ;;  %v643_v47 = vmul.f32 %v632_v43, %v1883_v40  ;;  %v642_v48 = vmul.f32 %v628_v44, %v1885_v41  ;;  %v636_v49 = vrot.slane %v620_v45, %v1790_v58 }
 0x737   :  { %646 = vadd.xlane.f32.xlu0 %v645_v46 }
 0x738   :  { %v651_v50 = vsel %vm116_vm0, %v643_v47, 0.0  ;;  %v648_v51 = vsel %vm116_vm0, %v642_v48, 0.0  ;;  %v644_v52 = vmul.f32 %v636_v49, %v1894_v28 }
 0x739   :  { %652 = vadd.xlane.f32.xlu1 %v651_v50 }
 0x73a   :  { %v654_v53 = vsel %vm116_vm0, %v644_v52, 0.0 }
 0x73b   :  { %649 = vadd.xlane.f32.xlu0 %v648_v51 }
 0x73f   :  { %655 = vadd.xlane.f32.xlu0 %v654_v53 }
 0x7c4   :  { %v647_v3 = vpop.xlane.xlu0 %646 }
 0x7c5   :  { %v678_v4 = vadd.f32 %v661_v62, %v647_v3 }
 0x7c6   :  { %v653_v5 = vpop.xlane.xlu1 %652 }
 0x7c7   :  { %687 = vperm.xlu1 %1342, %v678_v4   ;;  %v680_v10 = vadd.f32 %v669_v6, %v653_v5 }
 0x7c8   :  { %v650_v9 = vpop.xlane.xlu0 %649 }
 0x7c9   :  { %v679_v11 = vadd.f32 %v665_v7, %v650_v9 }
 0x7cb   :  { %693 = vperm.xlu1 %1342, %v680_v10   ;;  %690 = vperm.xlu0 %1343, %v679_v11  }
 0x7cc   :  { %v656_v14 = vpop.xlane.xlu0 %655 }
 0x7cd   :  { %v681_v15 = vadd.f32 %v673_v12, %v656_v14 }
 0x7cf   :  { %696 = vperm.xlu1 %1342, %v681_v15  }
 0x846   :  { %v688_v18 = vpop.permute.xlu1 %687 }
 0x847   :  { %v703_v26 = vrot.slane %v688_v18, %v1912_v19 }
 0x84a   :  { %v694_v20 = vpop.permute.xlu1 %693  ;;  %v691_v23 = vpop.permute.xlu0 %690 }
 0x84b   :  { %v707_v27 = vrot.slane %v691_v23, %v1912_v19  ;;  %v711_v29 = vrot.slane %v694_v20, %v1912_v19 }
 0x84d   :  { %v717_v31 = vsel %vm716_vm5, %v707_v27, %v703_v26 }
 0x84e   :  { %v697_v13 = vpop.permute.xlu1 %696  ;;  %v719_v57 = vsel %vm718_vm6, %v711_v29, %v717_v31  ;;  %v898_v31 = vld [vmem:[#allocation10] sm:$0xff] }
 0x84f   :  { %v715_v56 = vrot.slane %v697_v13, %v1912_v19  ;;  %v899_v13 = vld [vmem:[#allocation10 + $0x8] sm:$0xff] }
 0x851   :  { %v721_v32 = vsel %vm720_vm7, %v715_v56, %v719_v57  ;;  %v1310_v56 = vpack.c.bf16 %v899_v13, %v898_v31  ;;  %v900_v57 = vld [vmem:[#allocation10 + $0x10] sm:$0xff] }
 0x852   :  { %v724_v33 = vsel %vm723_vm8, %v721_v32, -inf  ;;  %v901_v32 = vld [vmem:[#allocation10 + $0x18] sm:$0xff] }
 0x853   :  { %725 = vmax.xlane.f32.xlu1 %v724_v33  ;;  %1311 = vmatpush3.bf16.msra.mxu1 %v1310_v56  ;;  %v1313_v33 = vpack.c.bf16 %v901_v32, %v900_v57  ;;  %v1344_v56 = vpack.i.bf16 %v899_v13, %v898_v31 }
 0x854   :  { %1312 = vmatprep.subr.bf16.mxu1 %v1621_v2 }
 0x857   :  { %1314 = vmatpush3.bf16.msra.mxu1 %v1313_v33 }
 0x858   :  { %1315 = vmatprep.subr.bf16.mxu1 %v1621_v2 }
 0x8e0   :  { %v726_v34 = vpop.xlane.xlu1 %725 }
 0x8e1   :  { %v731_v35 = vrot.slane %v726_v34, %v1790_v58  ;;  %v735_v36 = vrot.slane %v726_v34, %v1796_v60  ;;  %v739_v38 = vrot.slane %v726_v34, %v1902_v63  ;;  %v743_v43 = vrot.slane %v726_v34, %v1907_v8 }
 0x8e3   :  { %v748_v1 = vsub.f32 %v678_v4, %v731_v35  ;;  %v749_v39 = vsub.f32 %v679_v11, %v735_v36  ;;  %v750_v44 = vsub.f32 %v680_v10, %v739_v38  ;;  %v751_v46 = vsub.f32 %v681_v15, %v743_v43 }
 0x8e5   :  { %v752_v42 = vmul.f32 1.442695, %v748_v1  ;;  %v754_v45 = vmul.f32 1.442695, %v749_v39  ;;  %v756_v47 = vmul.f32 1.442695, %v750_v44 }
 0x8e6   :  { %v758_v48 = vmul.f32 1.442695, %v751_v46 }
 0x8e7   :  { %1386 = vpow2.f32 %v752_v42 }
 0x8e8   :  { %1388 = vpow2.f32 %v754_v45 }
 0x8e9   :  { %1390 = vpow2.f32 %v756_v47 }
 0x8ea   :  { %1392 = vpow2.f32 %v758_v48 }
 0x8f1   :  { %v1387_v49 = vpop.eup %1386 }
 0x8f2   :  { %765 = vperm.xlu0 %1343, %v1387_v49   ;;  %v1389_v50 = vpop.eup %1388 }
 0x8f3   :  { %v1391_v51 = vpop.eup %1390 }
 0x8f4   :  { %v1393_v52 = vpop.eup %1392 }
 0x8f6   :  { %768 = vperm.xlu0 %1343, %v1389_v50  }
 0x8fa   :  { %771 = vperm.xlu0 %1343, %v1391_v51  }
 0x8fe   :  { %774 = vperm.xlu0 %1343, %v1393_v52  }
 0x971   :  { %v766_v53 = vpop.permute.xlu0 %765 }
 0x972   :  { %v779_v4 = vrot.slane %v766_v53, %v1912_v19 }
 0x975   :  { %v769_v55 = vpop.permute.xlu0 %768 }
 0x976   :  { %v783_v62 = vrot.slane %v769_v55, %v1912_v19 }
 0x978   :  { %v792_v6 = vsel %vm716_vm5, %v783_v62, %v779_v4 }
 0x979   :  { %v772_v61 = vpop.permute.xlu0 %771 }
 0x97a   :  { %v787_v3 = vrot.slane %v772_v61, %v1912_v19 }
 0x97c   :  { %v793_v9 = vsel %vm718_vm6, %v787_v3, %v792_v6 }
 0x97d   :  { %v775_v5 = vpop.permute.xlu0 %774 }
 0x97e   :  { %v791_v7 = vrot.slane %v775_v5, %v1912_v19 }
 0x980   :  { %v794_v10 = vsel %vm720_vm7, %v791_v7, %v793_v9 }
 0x981   :  { %v796_v11 = vsel %vm723_vm8, %v794_v10, 0.0 }
 0x982   :  { %797 = vadd.xlane.f32.xlu1 %v796_v11 }
 0xa0f   :  { %v798_v12 = vpop.xlane.xlu1 %797 }
 0xa10   :  { %1394 = vrcp.f32 %v798_v12 }
 0xa1a   :  { %v1395_v14 = vpop.eup %1394 }
 0xa1b   :  { %v808_v15 = vrot.slane %v1395_v14, %v1796_v60  ;;  %v804_v17 = vrot.slane %v1395_v14, %v1790_v58  ;;  %v812_v23 = vrot.slane %v1395_v14, %v1902_v63  ;;  %v816_v27 = vrot.slane %v1395_v14, %v1907_v8 }
 0xa1d   :  { %v822_v18 = vmul.f32 %v1389_v50, %v808_v15  ;;  %v821_v20 = vmul.f32 %v1387_v49, %v804_v17  ;;  %v823_v26 = vmul.f32 %v1391_v51, %v812_v23  ;;  %v824_v29 = vmul.f32 %v1393_v52, %v816_v27 }
 0xa1f   :  { %833 = vperm.xlu1 %1342, %v822_v18   ;;  %830 = vperm.xlu0 %1343, %v821_v20  }
 0xa23   :  { %836 = vperm.xlu0 %1343, %v823_v26   ;;  %1345 = vrot.lane.b32.xlu1 %v1344_v56, %s1619_s2 }
 0xa27   :  { %839 = vperm.xlu0 %1343, %v824_v29  }
 0xa9e   :  { %v834_v63 = vpop.permute.xlu1 %833  ;;  %v831_v34 = vpop.permute.xlu0 %830 }
 0xa9f   :  { %v867_v35 = vmul.f32 %v834_v63, %v1885_v41  ;;  %v866_v8 = vmul.f32 %v831_v34, %v1880_v37  ;;  %v848_v43 = vrot.slane %v834_v63, %v1912_v19  ;;  %v844_v44 = vrot.slane %v831_v34, %v1912_v19 }
 0xaa0   :  { %v1349_v34 = vpack.i.bf16 %v901_v32, %v900_v57 }
 0xaa1   :  { %v877_v36 = vsel %vm116_vm0, %v867_v35, 0.0  ;;  %v870_v38 = vsel %vm116_vm0, %v866_v8, 0.0  ;;  %v857_v52 = vsel %vm716_vm5, %v848_v43, %v844_v44  ;;  %v903_v35 = vld [vmem:[%s2050_s8] sm:$0x3]  ;;  %s1625_s8 = smov [#allocation12]  }
 0xaa2   :  { %v878_v1 = vrot.slane %v877_v36, 4  ;;  %v871_v39 = vrot.slane %v870_v38, 4  ;;  %v837_v42 = vpop.permute.xlu0 %836  ;;  %v1346_v31 = vpop.permute.xlu1 %1345  ;;  %s1121_s23 = sshll.u32 %s1625_s8, 4  ;;  %s1122_s23 = int_to_ptr.vmem [resolvable:$true] %s1121_s23 }
 0xaa3   :  { %v868_v45 = vmul.f32 %v837_v42, %v1883_v40  ;;  %v852_v48 = vrot.slane %v837_v42, %v1912_v19  ;;  %v1348_v13 = vunpack.i.h.bf16 %v1346_v31  ;;  %s1508_s24 = scalar_lea.vmem %s1122_s23, 64  ;;  %p1513_p13 = scmp.lt.s32.totalorder %s1122_s23, %s1122_s23 }
 0xaa4   :  { %v879_v46 = vadd.f32 %v878_v1, %v877_v36  ;;  %v872_v47 = vadd.f32 %v871_v39, %v870_v38  ;;  %p1509_p12 = scmp.ne.s32.totalorder %s1122_s23, %s1508_s24  ;;  %p1514_p0 = scmp.lt.s32.totalorder %s1508_s24, %s1508_s24 }
 0xaa5   :  { %v884_v41 = vsel %vm116_vm0, %v868_v45, 0.0  ;;  %v858_v40 = vsel %vm718_vm6, %v852_v48, %v857_v52 }
 0xaa6   :  { %v880_v37 = vrot.slane %v879_v46, 2  ;;  %v873_v49 = vrot.slane %v872_v47, 2  ;;  %v885_v50 = vrot.slane %v884_v41, 4  ;;  %v840_v51 = vpop.permute.xlu0 %839  ;;  %p1515_p1 = por %p1514_p0, %p1513_p13 }
 0xaa7   :  { %v856_v53 = vrot.slane %v840_v51, %v1912_v19  ;;  %v869_v55 = vmul.f32 %v840_v51, %v1894_v28 }
 0xaa8   :  { %v881_v61 = vadd.f32 %v880_v37, %v879_v46  ;;  %v874_v62 = vadd.f32 %v873_v49, %v872_v47  ;;  %v886_v3 = vadd.f32 %v885_v50, %v884_v41  ;;  %p1516_p2 = pnand %p1515_p1, %p1509_p12 }
 0xaa9   :  { %v891_v4 = vsel %vm116_vm0, %v869_v55, 0.0  ;;  %v859_v5 = vsel %vm720_vm7, %v856_v53, %v858_v40 }
 0xaaa   :  { %v887_v6 = vrot.slane %v886_v3, 2  ;;  %v892_v7 = vrot.slane %v891_v4, 4  ;;  %861 = vst.msk [vmem:[#allocation15] sm:$0xf] %vm723_vm8, %v859_v5  ;;  %v882_v9 = vrot.slane %v881_v61, 1  ;;  %v875_v10 = vrot.slane %v874_v62, 1 }
 0xaac   :  { %v888_v11 = vadd.f32 %v887_v6, %v886_v3  ;;  %v893_v12 = vadd.f32 %v892_v7, %v891_v4  ;;  %v883_v28 = vadd.f32 %v882_v9, %v881_v61  ;;  %v876_v15 = vadd.f32 %v875_v10, %v874_v62 }
 0xaae   :  { %v889_v19 = vrot.slane %v888_v11, 1  ;;  %v894_v14 = vrot.slane %v893_v12, 2  ;;  %v908_v26 = vsel %vm716_vm5, %v883_v28, %v876_v15 }
 0xab0   :  { %v895_v17 = vadd.f32 %v894_v14, %v893_v12  ;;  %v890_v18 = vadd.f32 %v889_v19, %v888_v11 }
 0xab2   :  { %v896_v20 = vrot.slane %v895_v17, 1  ;;  %v909_v27 = vsel %vm718_vm6, %v890_v18, %v908_v26 }
 0xab4   :  { %v897_v23 = vadd.f32 %v896_v20, %v895_v17 }
 0xab6   :  { %v910_v29 = vsel %vm720_vm7, %v897_v23, %v909_v27 }
 0xab7   :  { %1220 = vmatmul.mubr.msk.f32.vlgmr.msra.gmra.mrb[2].mxu1 %vm116_vm0, %v910_v29 }
 0xab8   :  { %1230 = vmatprep.mubr.msk.f32.mxu1 %vm1622_vm3, %v1617_v0  ;;  %v1006_v0 = vrot.slane %v903_v35, %v1796_v60 }
 0xb8a   :  { %v979_v33 = vpop.f32.mrb[2].mxu1 }
 0xb8b   :  { %984 = vrot.lane.b32.xlu0 %v979_v33, %s1618_s7  ;;  %v1221_v63 = vpop.f32.mrb[3].mxu1 }
 0xb8f   :  { %993 = vrot.lane.b32.xlu0 %v1866_v21, %s1619_s2  ;;  %v1347_v21 = vunpack.i.l.bf16 %v1346_v31 }
 0xb91   :  { %v1316_v57 = vpack.c.bf16 %v1348_v13, %v1347_v21 }
 0xb93   :  { %1350 = vrot.lane.b32.xlu0 %v1349_v34, %s1619_s2  ;;  %1317 = vmatpush3.bf16.msra.mxu1 %v1316_v57 }
 0xb94   :  { %1318 = vmatprep.subr.bf16.mxu1 %v1621_v2 }
 0xb97   :  { %485 = vrot.lane.b32.xlu0 %v1811_v22, %s1619_s2 }
 0xb9b   :  { %1028 = vrot.lane.b32.xlu0 %v1006_v0, %s1618_s7 }
 0xb9f   :  { %489 = vrot.lane.b32.xlu0 %v1844_v54, %s1618_s7  ;;  %v1002_v54 = vrot.slane %v903_v35, %v1790_v58 }
 0xbfd   :  { %v985_v32 = vpop.permute.xlu0 %984 }
 0xbfe   :  { %v987_v8 = vadd.f32 %v985_v32, %v1877_v16 }
 0xc01   :  { %v994_v36 = vpop.permute.xlu0 %993 }
 0xc02   :  { %v996_v38 = vadd.f32 %v994_v36, %v987_v8 }
 0xc04   :  { %1396 = vtanh.f32 %v996_v38 }
 0xc05   :  { %v1351_v22 = vpop.permute.xlu0 %1350 }
 0xc06   :  { %v1353_v60 = vunpack.i.h.bf16 %v1351_v22  ;;  %v1352_v1 = vunpack.i.l.bf16 %v1351_v22 }
 0xc08   :  { %v1319_v39 = vpack.c.bf16 %v1353_v60, %v1352_v1 }
 0xc09   :  { %v486_v2 = vpop.permute.xlu0 %485 }
 0xc0a   :  { %1320 = vmatpush3.bf16.msra.mxu1 %v1319_v39  ;;  %v496_v58 = vsel %vm116_vm0, %v486_v2, %v1816_v25 }
 0xc0d   :  { %v1029_v43 = vpop.permute.xlu0 %1028 }
 0xc0e   :  { %v1397_v42 = vpop.eup %1396 }
 0xc0f   :  { %1008 = vrot.lane.b32.xlu1 %v1397_v42, %s1619_s2 }
 0xc11   :  { %v490_v46 = vpop.permute.xlu0 %489 }
 0xc13   :  { %1026 = vrot.lane.b32.xlu1 %v1002_v54, %s1618_s7 }
 0xc17   :  { %479 = vrot.lane.b32.xlu1 %v1869_v24, %s1620_s16  ;;  %v497_v24 = vsel %vm296_vm2, %v496_v58, %v490_v46 }
 0xc1b   :  { %493 = vrot.lane.b32.xlu1 %v1846_v59, %s1620_s16 }
 0xc81   :  { %v1009_v16 = vpop.permute.xlu1 %1008 }
 0xc82   :  { %1231 = vmatmul.mubr.msk.f32.vlgmr.msra.gmra.mrb[4].mxu1 %vm116_vm0, %v1009_v16 }
 0xc85   :  { %v1027_v44 = vpop.permute.xlu1 %1026 }
 0xc89   :  { %v480_v45 = vpop.permute.xlu1 %479 }
 0xc8a   :  { %v482_v47 = vsel %vm296_vm2, %v1826_v30, %v480_v45 }
 0xc8b   :  { %483 = vst [vmem:[#allocation12] sm:$0xf] %v482_v47 }
 0xc8d   :  { %v494_v48 = vpop.permute.xlu1 %493 }
 0xc8e   :  { %v498_v59 = vsel %vm118_vm1, %v497_v24, %v494_v48 }
 0xc8f   :  { %499 = vst [vmem:[#allocation14] sm:$0xf] %v498_v59 }
 0xc90   :  { %1519 = shalt.err (!%p1516_p2)
}
 0xc91   :  { %s1520_s25 = scalar_lea.hbm %s2052_s10, 64 }
 0xc92   :  { %p1521_p3 = scmp.ne.s32.totalorder %s2052_s10, %s1520_s25  ;;  %p1524_p4 = scmp.lt.u32.totalorder %s1520_s25, %s2052_s10 }
 0xc94   :  { %p1526_p5 = pnand %p1524_p4, %p1521_p3 }
 0xc96   :  { %1529 = shalt.err (!%p1526_p5)
}
 0xc97   :  { %1124 = dma.vmem_to_hbm [thread:$0]  %s1122_s23, 64, %s2052_s10, [#allocation13]  }
 0xc98   :  { %s1626_s29 = smov [#allocation14]   ;;  %s1627_s7 = smov [#allocation15]  }
 0xc99   :  { %s1131_s30 = sshll.u32 %s1626_s29, 4  ;;  %s1141_s2 = sshll.u32 %s1627_s7, 4  ;;  %s1132_s30 = int_to_ptr.vmem [resolvable:$true] %s1131_s30  ;;  %s1142_s2 = int_to_ptr.vmem [resolvable:$true] %s1141_s2 }
 0xc9a   :  { %s1530_s13 = scalar_lea.vmem %s1132_s30, 64  ;;  %p1535_p7 = scmp.lt.s32.totalorder %s1132_s30, %s1132_s30 }
 0xc9b   :  { %p1531_p6 = scmp.ne.s32.totalorder %s1132_s30, %s1530_s13  ;;  %p1536_p8 = scmp.lt.s32.totalorder %s1530_s13, %s1530_s13 }
 0xc9d   :  { %p1537_p9 = por %p1536_p8, %p1535_p7 }
 0xc9f   :  { %p1538_p10 = pnand %p1537_p9, %p1531_p6 }
 0xca1   :  { %1541 = shalt.err (!%p1538_p10)
}
 0xca2   :  { %s1542_s15 = scalar_lea.hbm %s2053_s11, 64 }
 0xca3   :  { %p1543_p11 = scmp.ne.s32.totalorder %s2053_s11, %s1542_s15  ;;  %p1546_p12 = scmp.lt.u32.totalorder %s1542_s15, %s2053_s11 }
 0xca5   :  { %p1548_p13 = pnand %p1546_p12, %p1543_p11 }
 0xca7   :  { %1551 = shalt.err (!%p1548_p13)
}
 0xca8   :  { %1134 = dma.vmem_to_hbm [thread:$0]  %s1132_s30, 64, %s2053_s11, [#allocation13]  }
 0xca9   :  { %s1552_s19 = scalar_lea.vmem %s1142_s2, 64  ;;  %p1557_p1 = scmp.lt.s32.totalorder %s1142_s2, %s1142_s2 }
 0xcaa   :  { %p1553_p0 = scmp.ne.s32.totalorder %s1142_s2, %s1552_s19  ;;  %p1558_p2 = scmp.lt.s32.totalorder %s1552_s19, %s1552_s19 }
 0xcac   :  { %p1559_p3 = por %p1558_p2, %p1557_p1 }
 0xcae   :  { %p1560_p4 = pnand %p1559_p3, %p1553_p0 }
 0xcb0   :  { %1563 = shalt.err (!%p1560_p4)
}
 0xcb1   :  { %s1564_s23 = scalar_lea.hbm %s2054_s12, 64 }
 0xcb2   :  { %p1565_p5 = scmp.ne.s32.totalorder %s2054_s12, %s1564_s23  ;;  %p1568_p6 = scmp.lt.u32.totalorder %s1564_s23, %s2054_s12 }
 0xcb4   :  { %p1570_p7 = pnand %p1568_p6, %p1565_p5 }
 0xcb6   :  { %1573 = shalt.err (!%p1570_p7)
}
 0xcb7   :  { %1144 = dma.vmem_to_hbm [thread:$0]  %s1142_s2, 64, %s2054_s12, [#allocation16]   ;;  %v1030_v25 = vsel %vm116_vm0, %v1027_v44, %v1029_v43 }
 0xcb8   :  { %s1628_s28 = smov [#allocation11]  }
 0xcb9   :  { %s1111_s1 = sshll.u32 %s1628_s28, 4  ;;  %s1112_s1 = int_to_ptr.vmem [resolvable:$true] %s1111_s1 }
 0xcba   :  { %s1574_s22 = scalar_lea.vmem %s1112_s1, 64  ;;  %p1579_p9 = scmp.lt.s32.totalorder %s1112_s1, %s1112_s1 }
 0xcbb   :  { %p1575_p8 = scmp.ne.s32.totalorder %s1112_s1, %s1574_s22  ;;  %p1580_p10 = scmp.lt.s32.totalorder %s1574_s22, %s1574_s22 }
 0xcbd   :  { %p1581_p11 = por %p1580_p10, %p1579_p9 }
 0xcbf   :  { %p1582_p12 = pnand %p1581_p11, %p1575_p8 }
 0xd55   :  { %v1100_v30 = vpop.f32.mrb[4].mxu1 }
 0xd56   :  { %v1101_v41 = vadd.f32 %v1100_v30, %v1030_v25  ;;  %v1232_v37 = vpop.f32.mrb[5].mxu1 }
 0xd58   :  { %1104 = vst.msk [vmem:[#allocation11] sm:$0xf] %vm592_vm4, %v1101_v41 }
 0xd59   :  { %1585 = shalt.err (!%p1582_p12)
}
 0xd5a   :  { %s1586_s12 = scalar_lea.hbm %s2051_s9, 64 }
 0xd5b   :  { %p1587_p13 = scmp.ne.s32.totalorder %s2051_s9, %s1586_s12  ;;  %p1590_p0 = scmp.lt.u32.totalorder %s1586_s12, %s2051_s9 }
 0xd5d   :  { %p1592_p1 = pnand %p1590_p0, %p1587_p13 }
 0xd5f   :  { %1595 = shalt.err (!%p1592_p1)
}
 0xd60   :  { %1114 = dma.vmem_to_hbm [thread:$0]  %s1112_s1, 64, %s2051_s9, [#allocation4]  }
 0xd61   :  { %1602 = dma.done.wait [#allocation4], 64  }
 0xd62   :  { %1603 = vsyncadd [#allocation4], 4294967232 }
 0xd63   :  { %1604 = dma.done.wait [#allocation13], 128  }
 0xd64   :  { %1605 = vsyncadd [#allocation13], 4294967168 }
 0xd65   :  { %1606 = dma.done.wait [#allocation16], 64  }
 0xd66   :  { %1607 = vsyncadd [#allocation16], 4294967232 }
 0xd67   :  { %1157 = vsyncpa [#allocation3], 1 }
 0xd68   :  { %1158 = vsyncpa [#allocation6], 1 }
 0xd69   :  { %1159 = vsyncpa [#allocation9], 1 }
 0xd6a   :  { %1160 = vsyncpa [#allocation4], 1 }
 0xd6b   :  { %1161 = vsyncpa [#allocation13], 1 }
 0xd6c   :  { %1162 = vsyncpa [#allocation16], 1 }

</bundles_post_ra>
